<compile_context>
chip_gen: v7x
topology: tpu7x:2x2x1
jax: 0.10.0
libtpu: 0.0.40
codegen_flags: <defaults>
</compile_context>

<pallas_src>
import functools

import jax
import jax.numpy as jnp
from jax.experimental import pallas as pl
from jax.experimental.pallas import tpu as pltpu


def _round_up(x, m):
    return (x + m - 1) // m * m


def _tensorcores_per_chip():
    """Best-effort TensorCore count (v7x has 2 per chip; v5e/v6e have 1)."""
    try:
        dev = jax.devices()[0]
        for attr in ("num_cores", "num_tensorcores"):
            v = getattr(dev, attr, None)
            if isinstance(v, int) and v > 0:
                return min(v, 8)
    except Exception:
        pass
    return 1


# ----------------------------------------------------------------------------
# Kernel 1: LM logits projection + fused greedy argmax
#   hidden[T, H] (bf16, mask already applied) @ w_out[H, V] (bf16) -> argmax_v (int32[T])
# ----------------------------------------------------------------------------
def _logits_argmax_kernel(h_ref, w_ref, ids_ref, *scratch,
                          v_real, v_pad, tn, nj, nk):
    # ---- Fast path: whole vocab + whole hidden reduction in one grid step. ----
    # No accumulator scratch, no running (max, argmax) carry, no pl.when plumbing.
    if nj == 1 and nk == 1:
        logits = jnp.dot(h_ref[...], w_ref[...],
                         preferred_element_type=jnp.float32)      # (tm, tn) f32
        col = jax.lax.broadcasted_iota(jnp.int32, logits.shape, 1)
        if v_pad > v_real:                                        # trace-time gate
            logits = jnp.where(col < v_real, logits, -jnp.inf)
        row_max = jnp.max(logits, axis=-1, keepdims=True)
        # first column achieving the max (matches jnp.argmax semantics)
        ids_ref[...] = jnp.min(
            jnp.where(logits == row_max, col, jnp.int32(2 ** 30)),
            axis=-1, keepdims=True)
        return

    # ---- General tiled path (larger H / V). ----
    j = pl.program_id(1)            # vocab tile
    k = pl.program_id(2)            # hidden (reduction) tile
    if nk == 1:
        max_ref, idx_ref = scratch
        acc_ref = None
    else:
        acc_ref, max_ref, idx_ref = scratch

    @pl.when(jnp.logical_and(j == 0, k == 0))
    def _():
        max_ref[...] = jnp.full(max_ref.shape, -jnp.inf, max_ref.dtype)
        idx_ref[...] = jnp.zeros(idx_ref.shape, idx_ref.dtype)

    # MXU matmul, f32 accumulation.  Assign on the first K step (no zero-init store),
    # accumulate on later steps.
    if nk == 1:
        logits_this = jnp.dot(h_ref[...], w_ref[...],
                              preferred_element_type=jnp.float32)
    else:
        @pl.when(k == 0)
        def _():
            acc_ref[...] = jnp.dot(h_ref[...], w_ref[...],
                                   preferred_element_type=jnp.float32)

        @pl.when(k > 0)
        def _():
            acc_ref[...] += jnp.dot(h_ref[...], w_ref[...],
                                    preferred_element_type=jnp.float32)

    def _update(logits):
        col = jax.lax.broadcasted_iota(jnp.int32, logits.shape, 1) + j * tn
        tile_max = jnp.max(logits, axis=-1, keepdims=True)
        tile_idx = jnp.min(jnp.where(logits == tile_max, col, jnp.int32(2 ** 30)),
                           axis=-1, keepdims=True)
        better = tile_max > max_ref[...]
        idx_ref[...] = jnp.where(better, tile_idx, idx_ref[...])
        max_ref[...] = jnp.where(better, tile_max, max_ref[...])

    # After the K reduction for this vocab tile, fold it into the running (max, argmax).
    @pl.when(k == nk - 1)
    def _():
        logits = logits_this if nk == 1 else acc_ref[...]
        if v_pad > v_real:
            # Only the last vocab tile contains padded columns; interior tiles skip
            # the iota/compare/select masking entirely.
            @pl.when(j < nj - 1)
            def _():
                _update(logits)

            @pl.when(j == nj - 1)
            def _():
                col = (jax.lax.broadcasted_iota(jnp.int32, logits.shape, 1) + j * tn)
                _update(jnp.where(col < v_real, logits, -jnp.inf))
        else:
            _update(logits)

    @pl.when(jnp.logical_and(j == nj - 1, k == nk - 1))
    def _():
        ids_ref[...] = idx_ref[...]


def lm_greedy_ids(hidden_bf16, w_bf16, *, tn=512, tk=512, tm_cap=1024):
    """hidden[T,H] bf16 (mask pre-applied), w[H,V] bf16 -> greedy token ids int32[T]."""
    T, H = hidden_bf16.shape
    H2, V = w_bf16.shape
    assert H == H2

    # Tile sizes: lane-dense multiples of 128; tn a 256-multiple for the 2x256 MXUs.
    tk = min(tk, _round_up(H, 128))
    tn = min(tn, _round_up(V, 256))

    # T tiling: as few tiles as possible (W is re-streamed once per T tile), but keep
    # one tile per TensorCore on multi-core chips so the "parallel" axis engages both.
    cores = _tensorcores_per_chip()
    T128 = _round_up(T, 128)
    t_tiles = max(1, min(cores, T128 // 128))
    tm = min(_round_up((T128 + t_tiles - 1) // t_tiles, 128), tm_cap)

    T_pad, H_pad, V_pad = _round_up(T, tm), _round_up(H, tk), _round_up(V, tn)
    ni, nj, nk = T_pad // tm, V_pad // tn, H_pad // tk
    single_step = (nj == 1 and nk == 1)

    h_p = jnp.pad(hidden_bf16, ((0, T_pad - T), (0, H_pad - H)))
    w_p = jnp.pad(w_bf16, ((0, H_pad - H), (0, V_pad - V)))

    scratch_shapes = []
    if not single_step:
        if nk > 1:
            scratch_shapes.append(pltpu.VMEM((tm, tn), jnp.float32))  # f32 accumulator
        scratch_shapes.append(pltpu.VMEM((tm, 1), jnp.float32))       # running row max
        scratch_shapes.append(pltpu.VMEM((tm, 1), jnp.int32))         # running row argmax

    kernel = functools.partial(_logits_argmax_kernel,
                               v_real=V, v_pad=V_pad, tn=tn, nj=nj, nk=nk)
    ids = pl.pallas_call(
        kernel,
        out_shape=jax.ShapeDtypeStruct((T_pad, 1), jnp.int32),
        grid_spec=pltpu.PrefetchScalarGridSpec(
            num_scalar_prefetch=0,
            grid=(ni, nj, nk),
            in_specs=[
                pl.BlockSpec((tm, tk), lambda i, j, k: (i, k)),    # hidden
                pl.BlockSpec((tk, tn), lambda i, j, k: (k, j)),    # lm-head weights
            ],
            out_specs=pl.BlockSpec((tm, 1), lambda i, j, k: (i, 0)),
            scratch_shapes=scratch_shapes),
        compiler_params=pltpu.CompilerParams(
            # V and K carry state (argmax / accumulator), so only T is parallel.
            dimension_semantics=("parallel", "arbitrary", "arbitrary"),
            # <= 48 MiB keeps headroom inside the v7x 64 MiB/TC VMEM budget.
            vmem_limit_bytes=48 * 1024 * 1024),
    )(h_p, w_p)
    return ids[:T, 0]


# ----------------------------------------------------------------------------
# Kernel 2: compute_green() vectorized + mean, lane-dense (1, N_pad) layout
#   green_i = 0 if matched_i == 0 else matched_i / (matched_i + sum_j sig_ij)
# ----------------------------------------------------------------------------
def _green_kernel(matched_ref, sig_ref, scores_ref, mean_ref, *, n_real):
    matched = matched_ref[...]                                   # (1, Np)
    sig_sum = jnp.sum(sig_ref[...], axis=0, keepdims=True)       # (1, Np) (pad rows = 0)
    denom = matched + sig_sum
    safe_denom = jnp.where(denom == 0.0, 1.0, denom)
    green = jnp.where(matched == 0.0, 0.0, matched / safe_denom)
    scores_ref[...] = green                                      # padded lanes are 0
    mean_ref[...] = jnp.sum(green, axis=1, keepdims=True) / jnp.float32(n_real)


def green_scores(matched_findings, sig_errors):
    """matched: int[N], sig_errors: int[N, 6] -> (mean_green f32, scores f32[N])."""
    N = matched_findings.shape[0]
    Np = _round_up(N, 128)
    matched = jnp.pad(matched_findings.astype(jnp.float32).reshape(1, N),
                      ((0, 0), (0, Np - N)))
    # pad the 6 sub-categories up to 8 sublanes (zeros don't affect the sum)
    sig = jnp.pad(sig_errors.astype(jnp.float32).T, ((0, 2), (0, Np - N)))   # (8, Np)

    kernel = functools.partial(_green_kernel, n_real=N)
    scores, mean = pl.pallas_call(
        kernel,
        out_shape=(jax.ShapeDtypeStruct((1, Np), jnp.float32),
                   jax.ShapeDtypeStruct((1, 1), jnp.float32)),
        grid=(1,),
        in_specs=[
            pl.BlockSpec((1, Np), lambda i: (0, 0)),
            pl.BlockSpec((8, Np), lambda i: (0, 0)),
        ],
        out_specs=(
            pl.BlockSpec((1, Np), lambda i: (0, 0)),
            pl.BlockSpec((1, 1), lambda i: (0, 0)),
        ),
    )(matched, sig)
    return mean[0, 0], scores[0, :N]


# ----------------------------------------------------------------------------
# GREEN.forward — numeric portion
# ----------------------------------------------------------------------------
def green_forward(input_ids, attention_mask, embed_table, w_out,
                  matched_findings, sig_errors):
    """
    input_ids:        int32[N, S]
    attention_mask:   int32[N, S]
    embed_table:      f32[V, H]   (deterministic synthetic LM params)
    w_out:            f32[H, V]
    matched_findings: int32[N], sig_errors: int32[N, 6]  (stand-in for regex-parsed counts)
    Returns (mean_green, final_scores[N], output_ids[N, S]) matching the torch module's
    (mean_green, final_scores, responses) structure (responses as greedy token ids).
    """
    N, S = input_ids.shape

    # --- get_response(): LM forward proxy.
    # Mask multiply is applied ONCE here (fused by XLA with the embedding gather) instead
    # of once per vocab tile inside the kernel.
    # TODO(synk): the embedding gather could be pulled into the kernel via a scalar-prefetch
    #             DMA row gather to avoid materializing hidden in HBM; kept in JAX here.
    hidden = (embed_table[input_ids.reshape(-1)]
              * attention_mask.reshape(-1, 1).astype(jnp.float32)).astype(jnp.bfloat16)
    w_bf16 = w_out.astype(jnp.bfloat16)

    # logits matmul + greedy argmax fused in one Pallas kernel (logits never hit HBM)
    output_ids = lm_greedy_ids(hidden, w_bf16).reshape(N, S)

    # TODO(synk): batch_decode + regex parse_error_counts -> counts (no Pallas equivalent);
    #             counts are provided as tensors instead.

    # --- compute_green() + final_scores.mean() in Pallas
    mean_green, final_scores = green_scores(matched_findings, sig_errors)
    return mean_green, final_scores, output_ids


if __name__ == "__main__":
    key = jax.random.PRNGKey(0)
    k_ids, k_emb, k_out, k_match, k_sig = jax.random.split(key, 5)

    # 8 (ref, hyp) pairs, seq 32, hidden 128, vocab 384 (padded to 512 inside the kernel)
    N, S, H, V = 8, 32, 128, 384

    input_ids = jax.random.randint(k_ids, (N, S), 0, V, dtype=jnp.int32)
    attention_mask = jnp.ones((N, S), dtype=jnp.int32).at[:, :4].set(0)   # left padding

    # Deterministic synthetic LM parameters (stand-in for the pretrained checkpoint)
    embed_table = jax.random.normal(k_emb, (V, H), dtype=jnp.float32) * 0.05
    w_out = jax.random.normal(k_out, (H, V), dtype=jnp.float32) * 0.05

    # Synthetic parsed error counts (what parse_error_counts would return)
    matched_findings = jax.random.randint(k_match, (N,), 0, 5, dtype=jnp.int32).at[0].set(0)
    sig_errors = jax.random.randint(k_sig, (N, 6), 0, 3, dtype=jnp.int32)

    mean_green, final_scores, output_ids = green_forward(
        input_ids, attention_mask, embed_table, w_out, matched_findings, sig_errors)
    jax.block_until_ready((mean_green, final_scores, output_ids))

    # Reference check (plain JAX) for green-score semantics and greedy ids
    m = matched_findings.astype(jnp.float32)
    s = jnp.sum(sig_errors.astype(jnp.float32), axis=-1)
    denom = m + s
    ref_scores = jnp.where(m == 0.0, 0.0, m / jnp.where(denom == 0.0, 1.0, denom))

    h_ref = (embed_table[input_ids.reshape(-1)]
             * attention_mask.reshape(-1, 1).astype(jnp.float32)).astype(jnp.bfloat16)
    ref_logits = jnp.dot(h_ref, w_out.astype(jnp.bfloat16),
                         preferred_element_type=jnp.float32)
    ref_ids = jnp.argmax(ref_logits, axis=-1).reshape(N, S).astype(jnp.int32)

    assert jnp.allclose(final_scores, ref_scores, atol=1e-6)
    assert jnp.allclose(mean_green, ref_scores.mean(), atol=1e-6)
    assert jnp.array_equal(output_ids, ref_ids)

    print("KERNEL_OK")
</pallas_src>

<mosaic_0001>
module attributes {stable_mosaic.version = 11 : i64} {
  func.func @_logits_argmax_kernel(%arg0: i32, %arg1: i32, %arg2: i32, %arg3: memref<256x128xbf16, #tpu.memory_space<vmem>>, %arg4: memref<128x512xbf16, #tpu.memory_space<vmem>>, %arg5: memref<256x1xi32, #tpu.memory_space<vmem>>) attributes {dimension_semantics = [#tpu.dimension_semantics<parallel>, #tpu.dimension_semantics<arbitrary>, #tpu.dimension_semantics<arbitrary>], iteration_bounds = array<i64: 1, 1, 1>, scalar_prefetch = 0 : i64, scratch_operands = 0 : i64, tpu.core_type = #tpu.core_type<tc>, window_params = [{transform_indices = @transform_0, window_bounds = array<i64: 256, 128>}, {transform_indices = @transform_1, window_bounds = array<i64: 128, 512>}, {transform_indices = @transform_2, window_bounds = array<i64: 256, 1>}]} {
    %c0 = arith.constant 0 : index
    %c0_0 = arith.constant 0 : index
    %0 = vector.load %arg3[%c0, %c0_0] : memref<256x128xbf16, #tpu.memory_space<vmem>>, vector<256x128xbf16>
    %c0_1 = arith.constant 0 : index
    %c0_2 = arith.constant 0 : index
    %1 = vector.load %arg4[%c0_1, %c0_2] : memref<128x512xbf16, #tpu.memory_space<vmem>>, vector<128x512xbf16>
    %cst = arith.constant dense<0.000000e+00> : vector<256x512xf32>
    %2 = tpu.matmul %0, %1, %cst {dimension_numbers = #tpu.dot_dimension_numbers<[1], [0], [0], [1], [0, 0, 1, 1], [], []>} : vector<256x128xbf16>, vector<128x512xbf16>, vector<256x512xf32> -> vector<256x512xf32>
    %3 = tpu.iota {dimensions = array<i32: 1>} : vector<256x512xi32>
    %c384_i32 = arith.constant 384 : i32
    %4 = vector.broadcast %c384_i32 : i32 to vector<256x512xi32>
    %5 = arith.cmpi slt, %3, %4 : vector<256x512xi32>
    %cst_3 = arith.constant 0xFF800000 : f32
    %6 = vector.broadcast %cst_3 : f32 to vector<256x512xf32>
    %7 = arith.select %5, %2, %6 : vector<256x512xi1>, vector<256x512xf32>
    %cst_4 = arith.constant dense<0xFF800000> : vector<256xf32>
    %8 = vector.multi_reduction <maximumf>, %7, %cst_4 [1] : vector<256x512xf32> to vector<256xf32>
    %9 = vector.shape_cast %8 : vector<256xf32> to vector<256x1xf32>
    %10 = vector.broadcast %9 : vector<256x1xf32> to vector<256x512xf32>
    %11 = arith.cmpf oeq, %7, %10 : vector<256x512xf32>
    %c1073741824_i32 = arith.constant 1073741824 : i32
    %12 = vector.broadcast %c1073741824_i32 : i32 to vector<256x512xi32>
    %13 = arith.select %11, %3, %12 : vector<256x512xi1>, vector<256x512xi32>
    %cst_5 = arith.constant dense<2147483647> : vector<256xi32>
    %14 = vector.multi_reduction <minsi>, %13, %cst_5 [1] : vector<256x512xi32> to vector<256xi32>
    %15 = vector.shape_cast %14 : vector<256xi32> to vector<256x1xi32>
    %c0_6 = arith.constant 0 : index
    %c0_7 = arith.constant 0 : index
    %16 = vector.load %arg5[%c0_6, %c0_7] : memref<256x1xi32, #tpu.memory_space<vmem>>, vector<256x1xi32>
    tpu.vector_store %arg5[%c0_6, %c0_7], %15 {strides = array<i32>} : memref<256x1xi32, #tpu.memory_space<vmem>>, vector<256x1xi32>,
    return
  }
  func.func @transform_0(%arg0: i32, %arg1: i32, %arg2: i32) -> (i32, i32) {
    %c0_i32 = arith.constant 0 : i32
    return %arg0, %arg2 : i32, i32
  }
  func.func @transform_1(%arg0: i32, %arg1: i32, %arg2: i32) -> (i32, i32) {
    %c0_i32 = arith.constant 0 : i32
    return %arg2, %arg1 : i32, i32
  }
  func.func @transform_2(%arg0: i32, %arg1: i32, %arg2: i32) -> (i32, i32) {
    %c0_i32 = arith.constant 0 : i32
    %c0_i32_0 = arith.constant 0 : i32
    return %arg0, %c0_i32 : i32, i32
  }
}

</mosaic_0001>

<bundles_post_ra>
// kernel: tpu_custom_call.1
= control target key start
LH: loop header
LB: loop body
LE: loop exit
PB: predicated region body
PF: predicated region fallthrough
CT: control target
= control target key end

     0   :  { %7 = vsyncpa [#allocation3], 0  ;;  %s3335_s0 = inlined_call_operand.hbm [shape: bf16[256,128], index: 0, kind: input, shape index: {}]   ;;  %s3336_s1 = inlined_call_operand.hbm [shape: bf16[128,512], index: 1, kind: input, shape index: {}]   ;;  %s3337_s2 = inlined_call_operand.vmem [shape: s32[256,1], index: 2, kind: output, shape index: {}]  }
   0x1   :  { %8 = vsyncpa [#allocation5], 0  ;;  %s2177_s9 = smov [#allocation2]   ;;  %s2129_s13 = scalar_lea.hbm %s3335_s0, 2048 }
   0x2   :  { %s14_s10 = sshll.u32 %s2177_s9, 4  ;;  %p2130_p0 = scmp.ne.s32.totalorder %s3335_s0, %s2129_s13  ;;  %s15_s10 = int_to_ptr.vmem [resolvable:$true] %s14_s10 }
   0x3   :  { %p2133_p1 = scmp.lt.u32.totalorder %s2129_s13, %s3335_s0 }
   0x5   :  { %p2135_p2 = pnand %p2133_p1, %p2130_p0 }
   0x7   :  { %2138 = shalt.err (!%p2135_p2)
}
   0x8   :  { %s2139_s18 = scalar_lea.vmem %s15_s10, 2048  ;;  %p2144_p4 = scmp.lt.s32.totalorder %s15_s10, %s15_s10 }
   0x9   :  { %p2140_p3 = scmp.ne.s32.totalorder %s15_s10, %s2139_s18  ;;  %p2145_p5 = scmp.lt.s32.totalorder %s2139_s18, %s2139_s18 }
   0xb   :  { %p2146_p6 = por %p2145_p5, %p2144_p4 }
   0xd   :  { %p2147_p7 = pnand %p2146_p6, %p2140_p3 }
   0xf   :  { %2150 = shalt.err (!%p2147_p7)
}
  0x10   :  { %s2178_s19 = smov 64   ;;  %s2179_s20 = smov 4  }
  0x11   :  { %20 = dma.hbm_to_vmem [thread:$0]  %s3335_s0, 2048, %s15_s10, [#allocation3], %s2178_s19, %s2178_s19, %s2179_s20  }
  0x12   :  { %s2180_s23 = smov [#allocation4]   ;;  %s2151_s27 = scalar_lea.hbm %s3336_s1, 4096 }
  0x13   :  { %s26_s24 = sshll.u32 %s2180_s23, 4  ;;  %p2152_p8 = scmp.ne.s32.totalorder %s3336_s1, %s2151_s27  ;;  %s27_s24 = int_to_ptr.vmem [resolvable:$true] %s26_s24 }
  0x14   :  { %p2155_p9 = scmp.lt.u32.totalorder %s2151_s27, %s3336_s1 }
  0x16   :  { %p2157_p10 = pnand %p2155_p9, %p2152_p8 }
  0x18   :  { %2160 = shalt.err (!%p2157_p10)
}
  0x19   :  { %s2161_s4 = scalar_lea.vmem %s27_s24, 4096  ;;  %p2166_p12 = scmp.lt.s32.totalorder %s27_s24, %s27_s24 }
  0x1a   :  { %p2162_p11 = scmp.ne.s32.totalorder %s27_s24, %s2161_s4  ;;  %p2167_p13 = scmp.lt.s32.totalorder %s2161_s4, %s2161_s4 }
  0x1c   :  { %p2168_p0 = por %p2167_p13, %p2166_p12 }
  0x1e   :  { %p2169_p1 = pnand %p2168_p0, %p2162_p11 }
  0x20   :  { %2172 = shalt.err (!%p2169_p1)
}
  0x21   :  { %s2181_s0 = smov 256   ;;  %s2182_s5 = smov 16  }
  0x22   :  { %32 = dma.hbm_to_vmem [thread:$0]  %s3336_s1, 4096, %s27_s24, [#allocation5], %s2181_s0, %s2181_s0, %s2182_s5  }
  0x23   :  { %2173 = dma.done.wait [#allocation3], 2048  }
  0x24   :  { %2174 = vsyncadd [#allocation3], 4294965248 }
  0x25   :  { %2175 = dma.done.wait [#allocation5], 4096  }
  0x26   :  { %2176 = vsyncadd [#allocation5], 4294963200  ;;  %v2183_v0 = vmov 0   ;;  %v2065_v1 = vld [vmem:[#allocation4 + $0x4] ss:$16 sps:$4 sm:$0xff]   ;;  %v2114_v34 = vld [vmem:[#allocation2 + $0x8] sm:$0xff]  }
  0x27   :  { %392 = vmatprep.mubr.bf16.mxu0 %v2183_v0  ;;  %585 = vmatprep.mubr.bf16.mxu1 %v2183_v0  ;;  %v2067_v2 = vld [vmem:[#allocation4 + $0xc] ss:$16 sps:$4 sm:$0xff]   ;;  %v2069_v3 = vld [vmem:[#allocation4] ss:$16 sps:$4 sm:$0xff]   ;;  %v2070_v4 = vld [vmem:[#allocation4 + $0x8] ss:$16 sps:$4 sm:$0xff]  }
  0x28   :  { %360 = vmatprep.subr.bf16.mxu0 %v2065_v1  ;;  %553 = vmatprep.subr.bf16.mxu1 %v2067_v2  ;;  %v2071_v5 = vld [vmem:[#allocation4 + $0x24] ss:$16 sps:$4 sm:$0xff]   ;;  %v2073_v6 = vld [vmem:[#allocation4 + $0x2c] ss:$16 sps:$4 sm:$0xff]   ;;  %v2075_v7 = vld [vmem:[#allocation4 + $0x20] ss:$16 sps:$4 sm:$0xff]  }
  0x29   :  { %361 = vmatpush1.bf16.msra.mxu0 %v2069_v3  ;;  %554 = vmatpush1.bf16.msra.mxu1 %v2070_v4  ;;  %v2076_v8 = vld [vmem:[#allocation4 + $0x28] ss:$16 sps:$4 sm:$0xff]   ;;  %v2077_v9 = vld [vmem:[#allocation4 + $0x44] ss:$16 sps:$4 sm:$0xff]   ;;  %v2079_v10 = vld [vmem:[#allocation4 + $0x4c] ss:$16 sps:$4 sm:$0xff]  }
  0x2a   :  { %362 = vmatprep.subr.bf16.mxu0 %v2071_v5  ;;  %555 = vmatprep.subr.bf16.mxu1 %v2073_v6  ;;  %v2081_v11 = vld [vmem:[#allocation4 + $0x40] ss:$16 sps:$4 sm:$0xff]   ;;  %v2082_v12 = vld [vmem:[#allocation4 + $0x48] ss:$16 sps:$4 sm:$0xff]   ;;  %v2083_v13 = vld [vmem:[#allocation4 + $0x64] ss:$16 sps:$4 sm:$0xff]  }
  0x2b   :  { %v2085_v14 = vld [vmem:[#allocation4 + $0x6c] ss:$16 sps:$4 sm:$0xff]   ;;  %v2087_v15 = vld [vmem:[#allocation4 + $0x60] ss:$16 sps:$4 sm:$0xff]   ;;  %v2088_v16 = vld [vmem:[#allocation4 + $0x68] ss:$16 sps:$4 sm:$0xff]  }
  0x2c   :  { %v2089_v17 = vld [vmem:[#allocation4 + $0x84] ss:$16 sps:$4 sm:$0xff]   ;;  %v2091_v18 = vld [vmem:[#allocation4 + $0x8c] ss:$16 sps:$4 sm:$0xff]   ;;  %v2093_v19 = vld [vmem:[#allocation4 + $0x80] ss:$16 sps:$4 sm:$0xff]  }
  0x2d   :  { %363 = vmatpush1.bf16.msra.mxu0 %v2075_v7  ;;  %556 = vmatpush1.bf16.msra.mxu1 %v2076_v8  ;;  %v2094_v20 = vld [vmem:[#allocation4 + $0x88] ss:$16 sps:$4 sm:$0xff]   ;;  %v2095_v21 = vld [vmem:[#allocation4 + $0xa4] ss:$16 sps:$4 sm:$0xff]   ;;  %v2097_v22 = vld [vmem:[#allocation4 + $0xac] ss:$16 sps:$4 sm:$0xff]  }
  0x2e   :  { %364 = vmatprep.subr.bf16.mxu0 %v2077_v9  ;;  %557 = vmatprep.subr.bf16.mxu1 %v2079_v10  ;;  %v2099_v23 = vld [vmem:[#allocation4 + $0xa0] ss:$16 sps:$4 sm:$0xff]   ;;  %v2100_v24 = vld [vmem:[#allocation4 + $0xa8] ss:$16 sps:$4 sm:$0xff]   ;;  %v2101_v25 = vld [vmem:[#allocation4 + $0xc4] ss:$16 sps:$4 sm:$0xff]  }
  0x2f   :  { %v2103_v26 = vld [vmem:[#allocation4 + $0xcc] ss:$16 sps:$4 sm:$0xff]   ;;  %v2105_v27 = vld [vmem:[#allocation4 + $0xc0] ss:$16 sps:$4 sm:$0xff]   ;;  %v2106_v28 = vld [vmem:[#allocation4 + $0xc8] ss:$16 sps:$4 sm:$0xff]  }
  0x30   :  { %v2107_v29 = vld [vmem:[#allocation4 + $0xe4] ss:$16 sps:$4 sm:$0xff]   ;;  %v2109_v30 = vld [vmem:[#allocation4 + $0xec] ss:$16 sps:$4 sm:$0xff]   ;;  %v2111_v31 = vld [vmem:[#allocation4 + $0xe0] ss:$16 sps:$4 sm:$0xff]  }
  0x31   :  { %365 = vmatpush1.bf16.msra.mxu0 %v2081_v11  ;;  %558 = vmatpush1.bf16.msra.mxu1 %v2082_v12  ;;  %v2112_v32 = vld [vmem:[#allocation4 + $0xe8] ss:$16 sps:$4 sm:$0xff]   ;;  %v2113_v33 = vld [vmem:[#allocation2] sm:$0xff]   ;;  %v2115_v35 = vld [vmem:[#allocation2 + $0x10] sm:$0xff]  }
  0x32   :  { %366 = vmatprep.subr.bf16.mxu0 %v2083_v13  ;;  %559 = vmatprep.subr.bf16.mxu1 %v2085_v14  ;;  %v2116_v36 = vld [vmem:[#allocation2 + $0x18] sm:$0xff]   ;;  %v2117_v37 = vld [vmem:[#allocation2 + $0x20] sm:$0xff]   ;;  %v2118_v38 = vld [vmem:[#allocation2 + $0x28] sm:$0xff]  }
  0x33   :  { %v2119_v39 = vld [vmem:[#allocation2 + $0x30] sm:$0xff]   ;;  %v2120_v40 = vld [vmem:[#allocation2 + $0x38] sm:$0xff]   ;;  %v2121_v41 = vld [vmem:[#allocation2 + $0x40] sm:$0xff]  }
  0x34   :  { %v2122_v42 = vld [vmem:[#allocation2 + $0x48] sm:$0xff]   ;;  %v2123_v43 = vld [vmem:[#allocation2 + $0x50] sm:$0xff]   ;;  %v2124_v44 = vld [vmem:[#allocation2 + $0x58] sm:$0xff]  }
  0x35   :  { %367 = vmatpush1.bf16.msra.mxu0 %v2087_v15  ;;  %560 = vmatpush1.bf16.msra.mxu1 %v2088_v16  ;;  %v2125_v45 = vld [vmem:[#allocation2 + $0x60] sm:$0xff]   ;;  %v2126_v46 = vld [vmem:[#allocation2 + $0x68] sm:$0xff]   ;;  %v2127_v47 = vld [vmem:[#allocation2 + $0x70] sm:$0xff]  }
  0x36   :  { %368 = vmatprep.subr.bf16.mxu0 %v2089_v17  ;;  %561 = vmatprep.subr.bf16.mxu1 %v2091_v18  ;;  %v2128_v48 = vld [vmem:[#allocation2 + $0x78] sm:$0xff]  }
  0x39   :  { %369 = vmatpush1.bf16.msra.mxu0 %v2093_v19  ;;  %562 = vmatpush1.bf16.msra.mxu1 %v2094_v20 }
  0x3a   :  { %370 = vmatprep.subr.bf16.mxu0 %v2095_v21  ;;  %563 = vmatprep.subr.bf16.mxu1 %v2097_v22 }
  0x3d   :  { %371 = vmatpush1.bf16.msra.mxu0 %v2099_v23  ;;  %564 = vmatpush1.bf16.msra.mxu1 %v2100_v24 }
  0x3e   :  { %372 = vmatprep.subr.bf16.mxu0 %v2101_v25  ;;  %565 = vmatprep.subr.bf16.mxu1 %v2103_v26 }
  0x41   :  { %373 = vmatpush1.bf16.msra.mxu0 %v2105_v27  ;;  %566 = vmatpush1.bf16.msra.mxu1 %v2106_v28 }
  0x42   :  { %374 = vmatprep.subr.bf16.mxu0 %v2107_v29  ;;  %567 = vmatprep.subr.bf16.mxu1 %v2109_v30 }
  0x45   :  { %375 = vmatpush1.bf16.msra.mxu0 %v2111_v31  ;;  %568 = vmatpush1.bf16.msra.mxu1 %v2112_v32 }
  0x48   :  { %393 = vmatmul.mubr.bf16.vlgmr.msra.gmra.mrb[0].mxu0 %v2113_v33  ;;  %586 = vmatmul.mubr.bf16.vlgmr.msra.gmra.mrb[0].mxu1 %v2113_v33 }
  0x49   :  { %402 = vmatprep.mubr.bf16.mxu0 %v2183_v0  ;;  %595 = vmatprep.mubr.bf16.mxu1 %v2183_v0 }
  0x50   :  { %403 = vmatmul.mubr.bf16.gmra.mrb[4].mxu0 %v2114_v34  ;;  %596 = vmatmul.mubr.bf16.gmra.mrb[4].mxu1 %v2114_v34 }
  0x51   :  { %412 = vmatprep.mubr.bf16.mxu0 %v2183_v0  ;;  %605 = vmatprep.mubr.bf16.mxu1 %v2183_v0 }
  0x58   :  { %413 = vmatmul.mubr.bf16.gmra.mrb[8].mxu0 %v2115_v35  ;;  %606 = vmatmul.mubr.bf16.gmra.mrb[8].mxu1 %v2115_v35 }
  0x59   :  { %422 = vmatprep.mubr.bf16.mxu0 %v2183_v0  ;;  %615 = vmatprep.mubr.bf16.mxu1 %v2183_v0 }
  0x60   :  { %423 = vmatmul.mubr.bf16.gmra.mrb[12].mxu0 %v2116_v36  ;;  %616 = vmatmul.mubr.bf16.gmra.mrb[12].mxu1 %v2116_v36 }
  0x61   :  { %432 = vmatprep.mubr.bf16.mxu0 %v2183_v0  ;;  %625 = vmatprep.mubr.bf16.mxu1 %v2183_v0 }
  0x68   :  { %433 = vmatmul.mubr.bf16.gmra.mrb[16].mxu0 %v2117_v37  ;;  %626 = vmatmul.mubr.bf16.gmra.mrb[16].mxu1 %v2117_v37 }
  0x69   :  { %442 = vmatprep.mubr.bf16.mxu0 %v2183_v0  ;;  %635 = vmatprep.mubr.bf16.mxu1 %v2183_v0 }
  0x70   :  { %443 = vmatmul.mubr.bf16.gmra.mrb[20].mxu0 %v2118_v38  ;;  %636 = vmatmul.mubr.bf16.gmra.mrb[20].mxu1 %v2118_v38 }
  0x71   :  { %452 = vmatprep.mubr.bf16.mxu0 %v2183_v0  ;;  %645 = vmatprep.mubr.bf16.mxu1 %v2183_v0 }
  0x78   :  { %453 = vmatmul.mubr.bf16.gmra.mrb[24].mxu0 %v2119_v39  ;;  %646 = vmatmul.mubr.bf16.gmra.mrb[24].mxu1 %v2119_v39 }
  0x79   :  { %462 = vmatprep.mubr.bf16.mxu0 %v2183_v0  ;;  %655 = vmatprep.mubr.bf16.mxu1 %v2183_v0 }
  0x80   :  { %463 = vmatmul.mubr.bf16.gmra.mrb[28].mxu0 %v2120_v40  ;;  %656 = vmatmul.mubr.bf16.gmra.mrb[28].mxu1 %v2120_v40 }
  0x81   :  { %472 = vmatprep.mubr.bf16.mxu0 %v2183_v0  ;;  %665 = vmatprep.mubr.bf16.mxu1 %v2183_v0 }
  0x88   :  { %473 = vmatmul.mubr.bf16.gmra.mrb[32].mxu0 %v2121_v41  ;;  %666 = vmatmul.mubr.bf16.gmra.mrb[32].mxu1 %v2121_v41 }
  0x89   :  { %482 = vmatprep.mubr.bf16.mxu0 %v2183_v0  ;;  %675 = vmatprep.mubr.bf16.mxu1 %v2183_v0 }
  0x90   :  { %483 = vmatmul.mubr.bf16.gmra.mrb[36].mxu0 %v2122_v42  ;;  %676 = vmatmul.mubr.bf16.gmra.mrb[36].mxu1 %v2122_v42 }
  0x91   :  { %492 = vmatprep.mubr.bf16.mxu0 %v2183_v0  ;;  %685 = vmatprep.mubr.bf16.mxu1 %v2183_v0 }
  0x98   :  { %493 = vmatmul.mubr.bf16.gmra.mrb[40].mxu0 %v2123_v43  ;;  %686 = vmatmul.mubr.bf16.gmra.mrb[40].mxu1 %v2123_v43 }
  0x99   :  { %502 = vmatprep.mubr.bf16.mxu0 %v2183_v0  ;;  %695 = vmatprep.mubr.bf16.mxu1 %v2183_v0 }
  0xa0   :  { %503 = vmatmul.mubr.bf16.gmra.mrb[44].mxu0 %v2124_v44  ;;  %696 = vmatmul.mubr.bf16.gmra.mrb[44].mxu1 %v2124_v44 }
  0xa1   :  { %512 = vmatprep.mubr.bf16.mxu0 %v2183_v0  ;;  %705 = vmatprep.mubr.bf16.mxu1 %v2183_v0 }
  0xa8   :  { %513 = vmatmul.mubr.bf16.gmra.mrb[48].mxu0 %v2125_v45  ;;  %706 = vmatmul.mubr.bf16.gmra.mrb[48].mxu1 %v2125_v45 }
  0xa9   :  { %522 = vmatprep.mubr.bf16.mxu0 %v2183_v0  ;;  %715 = vmatprep.mubr.bf16.mxu1 %v2183_v0 }
  0xb0   :  { %523 = vmatmul.mubr.bf16.gmra.mrb[52].mxu0 %v2126_v46  ;;  %716 = vmatmul.mubr.bf16.gmra.mrb[52].mxu1 %v2126_v46 }
  0xb1   :  { %532 = vmatprep.mubr.bf16.mxu0 %v2183_v0  ;;  %725 = vmatprep.mubr.bf16.mxu1 %v2183_v0 }
  0xb8   :  { %533 = vmatmul.mubr.bf16.gmra.mrb[56].mxu0 %v2127_v47  ;;  %726 = vmatmul.mubr.bf16.gmra.mrb[56].mxu1 %v2127_v47 }
  0xb9   :  { %542 = vmatprep.mubr.bf16.mxu0 %v2183_v0  ;;  %735 = vmatprep.mubr.bf16.mxu1 %v2183_v0 }
  0xc0   :  { %543 = vmatmul.mubr.bf16.gmra.mrb[60].mxu0 %v2128_v48  ;;  %736 = vmatmul.mubr.bf16.gmra.mrb[60].mxu1 %v2128_v48 }
 0x11b   :  { %v2255_v49 = vpop.f32.mrb[0].mxu0  ;;  %v2257_v50 = vpop.f32.mrb[0].mxu1 }
 0x11c   :  { %v2259_v51 = vpop.f32.mrb[1].mxu0  ;;  %v589_v52 = vpop.f32.mrb[1].mxu1 }
 0x11d   :  { %v883_v53 = vmax.f32 %v2255_v49, %v2259_v51  ;;  %v2263_v54 = vpop.f32.mrb[2].mxu0  ;;  %v2265_v55 = vpop.f32.mrb[2].mxu1 }
 0x11e   :  { %v2267_v56 = vpop.f32.mrb[3].mxu0  ;;  %v593_v57 = vpop.f32.mrb[3].mxu1 }
 0x11f   :  { %v888_v58 = vmax.f32 %v2263_v54, %v2267_v56  ;;  %v884_v59 = vmax.f32 %v883_v53, %v2257_v50 }
 0x121   :  { %886 = vmax.xlane.f32.xlu0 %v884_v59  ;;  %v889_v60 = vmax.f32 %v888_v58, %v2265_v55 }
 0x123   :  { %v2273_v61 = vpop.f32.mrb[4].mxu0  ;;  %v2275_v62 = vpop.f32.mrb[4].mxu1 }
 0x124   :  { %v2277_v63 = vpop.f32.mrb[5].mxu0  ;;  %v599_v0 = vpop.f32.mrb[5].mxu1 }
 0x125   :  { %v893_v1 = vmax.f32 %v2273_v61, %v2277_v63  ;;  %v2281_v2 = vpop.f32.mrb[6].mxu1  ;;  %891 = vmax.xlane.f32.xlu0 %v889_v60  ;;  %v2283_v3 = vpop.f32.mrb[6].mxu0 }
 0x126   :  { %v2285_v4 = vpop.f32.mrb[7].mxu0  ;;  %v603_v5 = vpop.f32.mrb[7].mxu1 }
 0x127   :  { %v898_v6 = vmax.f32 %v2283_v3, %v2285_v4  ;;  %v894_v7 = vmax.f32 %v893_v1, %v2275_v62 }
 0x129   :  { %896 = vmax.xlane.f32.xlu1 %v894_v7  ;;  %v899_v8 = vmax.f32 %v898_v6, %v2281_v2 }
 0x12b   :  { %v2291_v9 = vpop.f32.mrb[8].mxu0  ;;  %v2293_v10 = vpop.f32.mrb[8].mxu1 }
 0x12c   :  { %v2295_v11 = vpop.f32.mrb[9].mxu0  ;;  %v609_v12 = vpop.f32.mrb[9].mxu1 }
 0x12d   :  { %v903_v13 = vmax.f32 %v2291_v9, %v2295_v11  ;;  %v2299_v14 = vpop.f32.mrb[10].mxu1  ;;  %901 = vmax.xlane.f32.xlu1 %v899_v8  ;;  %v2301_v15 = vpop.f32.mrb[10].mxu0 }
 0x12e   :  { %v2303_v16 = vpop.f32.mrb[11].mxu0  ;;  %v613_v17 = vpop.f32.mrb[11].mxu1 }
 0x12f   :  { %v908_v18 = vmax.f32 %v2301_v15, %v2303_v16  ;;  %v904_v19 = vmax.f32 %v903_v13, %v2293_v10 }
 0x131   :  { %906 = vmax.xlane.f32.xlu0 %v904_v19  ;;  %v909_v20 = vmax.f32 %v908_v18, %v2299_v14 }
 0x133   :  { %v2309_v21 = vpop.f32.mrb[12].mxu1  ;;  %911 = vmax.xlane.f32.xlu1 %v909_v20  ;;  %v2311_v22 = vpop.f32.mrb[12].mxu0 }
 0x134   :  { %v2313_v23 = vpop.f32.mrb[13].mxu0  ;;  %v619_v24 = vpop.f32.mrb[13].mxu1 }
 0x135   :  { %v913_v25 = vmax.f32 %v2311_v22, %v2313_v23  ;;  %v2317_v26 = vpop.f32.mrb[14].mxu0  ;;  %v2319_v27 = vpop.f32.mrb[14].mxu1 }
 0x136   :  { %v2321_v28 = vpop.f32.mrb[15].mxu0  ;;  %v623_v29 = vpop.f32.mrb[15].mxu1 }
 0x137   :  { %v918_v30 = vmax.f32 %v2317_v26, %v2321_v28  ;;  %v914_v31 = vmax.f32 %v913_v25, %v2309_v21 }
 0x139   :  { %916 = vmax.xlane.f32.xlu0 %v914_v31  ;;  %v919_v32 = vmax.f32 %v918_v30, %v2319_v27 }
 0x13b   :  { %v2327_v33 = vpop.f32.mrb[16].mxu1  ;;  %921 = vmax.xlane.f32.xlu1 %v919_v32  ;;  %v2329_v34 = vpop.f32.mrb[16].mxu0 }
 0x13c   :  { %v2331_v35 = vpop.f32.mrb[17].mxu0  ;;  %v629_v36 = vpop.f32.mrb[17].mxu1 }
 0x13d   :  { %v923_v37 = vmax.f32 %v2329_v34, %v2331_v35  ;;  %v2335_v38 = vpop.f32.mrb[18].mxu0  ;;  %v2337_v39 = vpop.f32.mrb[18].mxu1 }
 0x13e   :  { %v2339_v40 = vpop.f32.mrb[19].mxu0  ;;  %v633_v41 = vpop.f32.mrb[19].mxu1 }
 0x13f   :  { %v928_v42 = vmax.f32 %v2335_v38, %v2339_v40  ;;  %v924_v43 = vmax.f32 %v923_v37, %v2327_v33 }
 0x141   :  { %926 = vmax.xlane.f32.xlu0 %v924_v43  ;;  %v929_v44 = vmax.f32 %v928_v42, %v2337_v39 }
 0x143   :  { %v2345_v45 = vpop.f32.mrb[20].mxu1  ;;  %931 = vmax.xlane.f32.xlu1 %v929_v44  ;;  %v2347_v46 = vpop.f32.mrb[20].mxu0 }
 0x144   :  { %v2349_v47 = vpop.f32.mrb[21].mxu0  ;;  %v639_v48 = vpop.f32.mrb[21].mxu1 }
 0x145   :  { %v933_v52 = vmax.f32 %v2347_v46, %v2349_v47  ;;  %v2353_v53 = vpop.f32.mrb[22].mxu0  ;;  %v2355_v57 = vpop.f32.mrb[22].mxu1 }
 0x146   :  { %v2357_v58 = vpop.f32.mrb[23].mxu0  ;;  %v643_v59 = vpop.f32.mrb[23].mxu1 }
 0x147   :  { %v938_v60 = vmax.f32 %v2353_v53, %v2357_v58  ;;  %v934_v0 = vmax.f32 %v933_v52, %v2345_v45 }
 0x149   :  { %936 = vmax.xlane.f32.xlu0 %v934_v0  ;;  %v939_v1 = vmax.f32 %v938_v60, %v2355_v57 }
 0x14b   :  { %v2363_v5 = vpop.f32.mrb[24].mxu1  ;;  %941 = vmax.xlane.f32.xlu1 %v939_v1  ;;  %v2365_v6 = vpop.f32.mrb[24].mxu0 }
 0x14c   :  { %v2367_v7 = vpop.f32.mrb[25].mxu0  ;;  %v649_v8 = vpop.f32.mrb[25].mxu1 }
 0x14d   :  { %v943_v12 = vmax.f32 %v2365_v6, %v2367_v7  ;;  %v2371_v13 = vpop.f32.mrb[26].mxu0  ;;  %v2373_v17 = vpop.f32.mrb[26].mxu1 }
 0x14e   :  { %v2375_v18 = vpop.f32.mrb[27].mxu0  ;;  %v653_v19 = vpop.f32.mrb[27].mxu1 }
 0x14f   :  { %v948_v20 = vmax.f32 %v2371_v13, %v2375_v18  ;;  %v944_v24 = vmax.f32 %v943_v12, %v2363_v5 }
 0x151   :  { %946 = vmax.xlane.f32.xlu0 %v944_v24  ;;  %v949_v25 = vmax.f32 %v948_v20, %v2373_v17 }
 0x153   :  { %v2381_v29 = vpop.f32.mrb[28].mxu1  ;;  %951 = vmax.xlane.f32.xlu1 %v949_v25  ;;  %v2383_v30 = vpop.f32.mrb[28].mxu0 }
 0x154   :  { %v2385_v31 = vpop.f32.mrb[29].mxu0  ;;  %v659_v32 = vpop.f32.mrb[29].mxu1 }
 0x155   :  { %v953_v36 = vmax.f32 %v2383_v30, %v2385_v31  ;;  %v2389_v37 = vpop.f32.mrb[30].mxu0  ;;  %v2391_v41 = vpop.f32.mrb[30].mxu1 }
 0x156   :  { %v2393_v42 = vpop.f32.mrb[31].mxu0  ;;  %v663_v43 = vpop.f32.mrb[31].mxu1 }
 0x157   :  { %v958_v44 = vmax.f32 %v2389_v37, %v2393_v42  ;;  %v954_v48 = vmax.f32 %v953_v36, %v2381_v29 }
 0x159   :  { %956 = vmax.xlane.f32.xlu0 %v954_v48  ;;  %v959_v52 = vmax.f32 %v958_v44, %v2391_v41 }
 0x15b   :  { %v2399_v59 = vpop.f32.mrb[32].mxu1  ;;  %961 = vmax.xlane.f32.xlu1 %v959_v52  ;;  %v2401_v60 = vpop.f32.mrb[32].mxu0 }
 0x15c   :  { %3399 = vst [vmem:[#allocation8_spill] sm:$0xff] %v2399_v59  ;;  %v2403_v0 = vpop.f32.mrb[33].mxu0  ;;  %v669_v1 = vpop.f32.mrb[33].mxu1 }
 0x15d   :  { %3400 = vst [vmem:[#allocation9_spill] sm:$0xff] %v2403_v0  ;;  %v963_v8 = vmax.f32 %v2401_v60, %v2403_v0  ;;  %v2407_v12 = vpop.f32.mrb[34].mxu0  ;;  %v2409_v19 = vpop.f32.mrb[34].mxu1 }
 0x15e   :  { %3401 = vst [vmem:[#allocation10_spill] sm:$0xff] %v2407_v12  ;;  %3402 = vst [vmem:[#allocation11_spill] sm:$0xff] %v2409_v19  ;;  %v2411_v20 = vpop.f32.mrb[35].mxu0  ;;  %v673_v24 = vpop.f32.mrb[35].mxu1 }
 0x15f   :  { %3403 = vst [vmem:[#allocation12_spill] sm:$0xff] %v2411_v20  ;;  %v968_v25 = vmax.f32 %v2407_v12, %v2411_v20  ;;  %v964_v32 = vmax.f32 %v963_v8, %v2399_v59 }
 0x161   :  { %966 = vmax.xlane.f32.xlu0 %v964_v32  ;;  %v969_v36 = vmax.f32 %v968_v25, %v2409_v19 }
 0x163   :  { %v2417_v43 = vpop.f32.mrb[36].mxu1  ;;  %971 = vmax.xlane.f32.xlu1 %v969_v36  ;;  %v2419_v44 = vpop.f32.mrb[36].mxu0 }
 0x164   :  { %3404 = vst [vmem:[#allocation13_spill] sm:$0xff] %v2417_v43  ;;  %3405 = vst [vmem:[#allocation14_spill] sm:$0xff] %v2419_v44  ;;  %v2421_v48 = vpop.f32.mrb[37].mxu0  ;;  %v679_v52 = vpop.f32.mrb[37].mxu1 }
 0x165   :  { %3406 = vst [vmem:[#allocation15_spill] sm:$0xff] %v2421_v48  ;;  %v973_v1 = vmax.f32 %v2419_v44, %v2421_v48  ;;  %v2425_v24 = vpop.f32.mrb[38].mxu0  ;;  %v2427_v0 = vpop.f32.mrb[38].mxu1 }
 0x166   :  { %3407 = vst [vmem:[#allocation16_spill] sm:$0xff] %v2425_v24  ;;  %3408 = vst [vmem:[#allocation17_spill] sm:$0xff] %v2427_v0  ;;  %v2429_v20 = vpop.f32.mrb[39].mxu0  ;;  %v683_v8 = vpop.f32.mrb[39].mxu1 }
 0x167   :  { %3409 = vst [vmem:[#allocation18_spill] sm:$0xff] %v2429_v20  ;;  %v978_v25 = vmax.f32 %v2425_v24, %v2429_v20  ;;  %v974_v32 = vmax.f32 %v973_v1, %v2417_v43 }
 0x169   :  { %976 = vmax.xlane.f32.xlu0 %v974_v32  ;;  %v979_v36 = vmax.f32 %v978_v25, %v2427_v0 }
 0x16b   :  { %v2435_v19 = vpop.f32.mrb[40].mxu1  ;;  %981 = vmax.xlane.f32.xlu1 %v979_v36  ;;  %v2437_v52 = vpop.f32.mrb[40].mxu0 }
 0x16c   :  { %3410 = vst [vmem:[#allocation19_spill] sm:$0xff] %v2435_v19  ;;  %3411 = vst [vmem:[#allocation20_spill] sm:$0xff] %v2437_v52  ;;  %v2439_v48 = vpop.f32.mrb[41].mxu0  ;;  %v689_v44 = vpop.f32.mrb[41].mxu1 }
 0x16d   :  { %3412 = vst [vmem:[#allocation21_spill] sm:$0xff] %v2439_v48  ;;  %v983_v12 = vmax.f32 %v2437_v52, %v2439_v48  ;;  %v2443_v8 = vpop.f32.mrb[42].mxu0  ;;  %v2445_v59 = vpop.f32.mrb[42].mxu1 }
 0x16e   :  { %3413 = vst [vmem:[#allocation22_spill] sm:$0xff] %v2443_v8  ;;  %3414 = vst [vmem:[#allocation23_spill] sm:$0xff] %v2445_v59  ;;  %v2447_v20 = vpop.f32.mrb[43].mxu0  ;;  %v693_v1 = vpop.f32.mrb[43].mxu1 }
 0x16f   :  { %3415 = vst [vmem:[#allocation24_spill] sm:$0xff] %v2447_v20  ;;  %v988_v25 = vmax.f32 %v2443_v8, %v2447_v20  ;;  %v984_v32 = vmax.f32 %v983_v12, %v2435_v19 }
 0x171   :  { %986 = vmax.xlane.f32.xlu0 %v984_v32  ;;  %v989_v36 = vmax.f32 %v988_v25, %v2445_v59 }
 0x173   :  { %v2453_v0 = vpop.f32.mrb[44].mxu1  ;;  %991 = vmax.xlane.f32.xlu1 %v989_v36  ;;  %v2455_v44 = vpop.f32.mrb[44].mxu0 }
 0x174   :  { %3416 = vst [vmem:[#allocation25_spill] sm:$0xff] %v2453_v0  ;;  %3417 = vst [vmem:[#allocation26_spill] sm:$0xff] %v2455_v44  ;;  %v2457_v48 = vpop.f32.mrb[45].mxu0  ;;  %v699_v52 = vpop.f32.mrb[45].mxu1 }
 0x175   :  { %3418 = vst [vmem:[#allocation27_spill] sm:$0xff] %v2457_v48  ;;  %v993_v24 = vmax.f32 %v2455_v44, %v2457_v48  ;;  %v2461_v1 = vpop.f32.mrb[46].mxu0  ;;  %v2463_v43 = vpop.f32.mrb[46].mxu1 }
 0x176   :  { %3419 = vst [vmem:[#allocation28_spill] sm:$0xff] %v2461_v1  ;;  %3420 = vst [vmem:[#allocation29_spill] sm:$0xff] %v2463_v43  ;;  %v2465_v20 = vpop.f32.mrb[47].mxu0  ;;  %v703_v12 = vpop.f32.mrb[47].mxu1 }
 0x177   :  { %3421 = vst [vmem:[#allocation30_spill] sm:$0xff] %v2465_v20  ;;  %v998_v25 = vmax.f32 %v2461_v1, %v2465_v20  ;;  %v994_v32 = vmax.f32 %v993_v24, %v2453_v0 }
 0x179   :  { %996 = vmax.xlane.f32.xlu0 %v994_v32  ;;  %v999_v36 = vmax.f32 %v998_v25, %v2463_v43 }
 0x17b   :  { %v2471_v59 = vpop.f32.mrb[48].mxu1  ;;  %1001 = vmax.xlane.f32.xlu1 %v999_v36  ;;  %v2473_v52 = vpop.f32.mrb[48].mxu0 }
 0x17c   :  { %3422 = vst [vmem:[#allocation31_spill] sm:$0xff] %v2471_v59  ;;  %3423 = vst [vmem:[#allocation32_spill] sm:$0xff] %v2473_v52  ;;  %v2475_v48 = vpop.f32.mrb[49].mxu0  ;;  %v709_v44 = vpop.f32.mrb[49].mxu1 }
 0x17d   :  { %3424 = vst [vmem:[#allocation33_spill] sm:$0xff] %v2475_v48  ;;  %v1003_v8 = vmax.f32 %v2473_v52, %v2475_v48  ;;  %v2479_v12 = vpop.f32.mrb[50].mxu0  ;;  %v2481_v19 = vpop.f32.mrb[50].mxu1 }
 0x17e   :  { %3425 = vst [vmem:[#allocation34_spill] sm:$0xff] %v2479_v12  ;;  %3426 = vst [vmem:[#allocation35_spill] sm:$0xff] %v2481_v19  ;;  %v2483_v20 = vpop.f32.mrb[51].mxu0  ;;  %v713_v24 = vpop.f32.mrb[51].mxu1 }
 0x17f   :  { %3427 = vst [vmem:[#allocation36_spill] sm:$0xff] %v2483_v20  ;;  %v1008_v25 = vmax.f32 %v2479_v12, %v2483_v20  ;;  %v1004_v32 = vmax.f32 %v1003_v8, %v2471_v59 }
 0x181   :  { %1006 = vmax.xlane.f32.xlu0 %v1004_v32  ;;  %v1009_v36 = vmax.f32 %v1008_v25, %v2481_v19 }
 0x183   :  { %v2489_v43 = vpop.f32.mrb[52].mxu1  ;;  %1011 = vmax.xlane.f32.xlu1 %v1009_v36  ;;  %v2491_v44 = vpop.f32.mrb[52].mxu0 }
 0x184   :  { %3428 = vst [vmem:[#allocation37_spill] sm:$0xff] %v2489_v43  ;;  %3429 = vst [vmem:[#allocation38_spill] sm:$0xff] %v2491_v44  ;;  %v2493_v48 = vpop.f32.mrb[53].mxu0  ;;  %v719_v52 = vpop.f32.mrb[53].mxu1 }
 0x185   :  { %3430 = vst [vmem:[#allocation39_spill] sm:$0xff] %v2493_v48  ;;  %v1013_v1 = vmax.f32 %v2491_v44, %v2493_v48  ;;  %v2497_v24 = vpop.f32.mrb[54].mxu0  ;;  %v2499_v0 = vpop.f32.mrb[54].mxu1 }
 0x186   :  { %3431 = vst [vmem:[#allocation40_spill] sm:$0xff] %v2497_v24  ;;  %3432 = vst [vmem:[#allocation41_spill] sm:$0xff] %v2499_v0  ;;  %v2501_v20 = vpop.f32.mrb[55].mxu0  ;;  %v723_v8 = vpop.f32.mrb[55].mxu1 }
 0x187   :  { %3433 = vst [vmem:[#allocation42_spill] sm:$0xff] %v2501_v20  ;;  %v1018_v25 = vmax.f32 %v2497_v24, %v2501_v20  ;;  %v1014_v32 = vmax.f32 %v1013_v1, %v2489_v43 }
 0x189   :  { %1016 = vmax.xlane.f32.xlu0 %v1014_v32  ;;  %v1019_v36 = vmax.f32 %v1018_v25, %v2499_v0 }
 0x18b   :  { %v2507_v19 = vpop.f32.mrb[56].mxu1  ;;  %1021 = vmax.xlane.f32.xlu1 %v1019_v36  ;;  %v2509_v52 = vpop.f32.mrb[56].mxu0 }
 0x18c   :  { %3434 = vst [vmem:[#allocation43_spill] sm:$0xff] %v2509_v52  ;;  %v2511_v48 = vpop.f32.mrb[57].mxu0  ;;  %v729_v44 = vpop.f32.mrb[57].mxu1 }
 0x18d   :  { %3435 = vst [vmem:[#allocation44_spill] sm:$0xff] %v2511_v48  ;;  %v1023_v12 = vmax.f32 %v2509_v52, %v2511_v48  ;;  %v2515_v8 = vpop.f32.mrb[58].mxu0  ;;  %v2517_v59 = vpop.f32.mrb[58].mxu1 }
 0x18e   :  { %3436 = vst [vmem:[#allocation45_spill] sm:$0xff] %v2515_v8  ;;  %3437 = vst [vmem:[#allocation46_spill] sm:$0xff] %v2517_v59  ;;  %v2519_v20 = vpop.f32.mrb[59].mxu0  ;;  %v733_v1 = vpop.f32.mrb[59].mxu1 }
 0x18f   :  { %3438 = vst [vmem:[#allocation47_spill] sm:$0xff] %v2519_v20  ;;  %v1028_v25 = vmax.f32 %v2515_v8, %v2519_v20  ;;  %v1024_v32 = vmax.f32 %v1023_v12, %v2507_v19 }
 0x191   :  { %1026 = vmax.xlane.f32.xlu0 %v1024_v32  ;;  %v1029_v36 = vmax.f32 %v1028_v25, %v2517_v59 }
 0x193   :  { %v2525_v0 = vpop.f32.mrb[60].mxu1  ;;  %1031 = vmax.xlane.f32.xlu1 %v1029_v36  ;;  %v2527_v44 = vpop.f32.mrb[60].mxu0 }
 0x194   :  { %3439 = vst [vmem:[#allocation48_spill] sm:$0xff] %v2527_v44  ;;  %v2529_v48 = vpop.f32.mrb[61].mxu0  ;;  %v739_v52 = vpop.f32.mrb[61].mxu1 }
 0x195   :  { %3440 = vst [vmem:[#allocation49_spill] sm:$0xff] %v2529_v48  ;;  %v1033_v24 = vmax.f32 %v2527_v44, %v2529_v48  ;;  %v2533_v1 = vpop.f32.mrb[62].mxu0  ;;  %v2535_v43 = vpop.f32.mrb[62].mxu1  ;;  %v746_v52 = vlaneseq }
 0x196   :  { %3441 = vst [vmem:[#allocation50_spill] sm:$0xff] %v2535_v43  ;;  %v2537_v20 = vpop.f32.mrb[63].mxu0  ;;  %v743_v12 = vpop.f32.mrb[63].mxu1 }
 0x197   :  { %3442 = vst [vmem:[#allocation51_spill] sm:$0xff] %v2537_v20  ;;  %v1038_v25 = vmax.f32 %v2533_v1, %v2537_v20  ;;  %v1034_v32 = vmax.f32 %v1033_v24, %v2525_v0  ;;  %v2543_v59 = vand.u32 127, %v746_v52 }
 0x199   :  { %1036 = vmax.xlane.f32.xlu0 %v1034_v32  ;;  %v1039_v36 = vmax.f32 %v1038_v25, %v2535_v43  ;;  %v2546_v48 = vadd.s32 128, %v2543_v59  ;;  %v2549_v8 = vadd.s32 256, %v2543_v59  ;;  %v2557_v25 = vadd.s32 384, %v2543_v59 }
 0x19b   :  { %1041 = vmax.xlane.f32.xlu1 %v1039_v36 }
 0x1ae   :  { %v887_v44 = vpop.xlane.xlu0 %886 }
 0x1af   :  { %vm1043_vm0 = vcmp.eq.f32.partialorder %v2255_v49, %v887_v44  ;;  %vm1044_vm1 = vcmp.eq.f32.partialorder %v2259_v51, %v887_v44  ;;  %vm1045_vm2 = vcmp.eq.f32.partialorder %v2257_v50, %v887_v44  ;;  %vm2026_vm4 = vcmp.eq.f32.partialorder %v887_v44, -inf }
 0x1b0   :  { %v1171_v24 = vsel %vm1043_vm0, %v2543_v59, 1073741824  ;;  %v1172_v12 = vsel %vm1044_vm1, %v2546_v48, 1073741824  ;;  %v1173_v52 = vsel %vm1045_vm2, %v2549_v8, 1073741824  ;;  %v1174_v51 = vsel %vm2026_vm4, %v2557_v25, 1073741824 }
 0x1b1   :  { %vm1299_vm3 = vcmp.lt.s32.totalorder %v1171_v24, %v1172_v12 }
 0x1b2   :  { %v892_v32 = vpop.xlane.xlu0 %891  ;;  %v1300_v36 = vsel %vm1299_vm3, %v1171_v24, %v1172_v12 }
 0x1b3   :  { %vm1047_vm5 = vcmp.eq.f32.partialorder %v2263_v54, %v892_v32  ;;  %vm1048_vm6 = vcmp.eq.f32.partialorder %v2267_v56, %v892_v32  ;;  %vm1301_vm7 = vcmp.lt.s32.totalorder %v1300_v36, %v1173_v52  ;;  %vm1049_vm8 = vcmp.eq.f32.partialorder %v2265_v55, %v892_v32 }
 0x1b4   :  { %v1175_v49 = vsel %vm1047_vm5, %v2543_v59, 1073741824  ;;  %v1176_v50 = vsel %vm1048_vm6, %v2546_v48, 1073741824  ;;  %v1302_v43 = vsel %vm1301_vm7, %v1300_v36, %v1173_v52  ;;  %vm2027_vm11 = vcmp.eq.f32.partialorder %v892_v32, -inf }
 0x1b5   :  { %vm1319_vm9 = vcmp.lt.s32.totalorder %v1175_v49, %v1176_v50  ;;  %vm1303_vm10 = vcmp.lt.s32.totalorder %v1302_v43, %v1174_v51  ;;  %v1177_v54 = vsel %vm1049_vm8, %v2549_v8, 1073741824 }
 0x1b6   :  { %v897_v44 = vpop.xlane.xlu1 %896  ;;  %v1320_v24 = vsel %vm1319_vm9, %v1175_v49, %v1176_v50  ;;  %v2571_v20 = vsel %vm1303_vm10, %v1302_v43, %v1174_v51 }
 0x1b7   :  { %vm1051_vm12 = vcmp.eq.f32.partialorder %v2273_v61, %v897_v44  ;;  %vm1052_vm13 = vcmp.eq.f32.partialorder %v2277_v63, %v897_v44  ;;  %vm1053_vm14 = vcmp.eq.f32.partialorder %v2275_v62, %v897_v44  ;;  %v1306_v55 = vshra.s32 %v2571_v20, 16 }
 0x1b8   :  { %v1179_v56 = vsel %vm1051_vm12, %v2543_v59, 1073741824  ;;  %v1180_v12 = vsel %vm1052_vm13, %v2546_v48, 1073741824  ;;  %vm1321_vm0 = vcmp.lt.s32.totalorder %v1320_v24, %v1177_v54  ;;  %vm2028_vm1 = vcmp.eq.f32.partialorder %v897_v44, -inf }
 0x1b9   :  { %vm1339_vm15 = vcmp.lt.s32.totalorder %v1179_v56, %v1180_v12  ;;  %v1322_v52 = vsel %vm1321_vm0, %v1320_v24, %v1177_v54  ;;  %v1178_v61 = vsel %vm2027_vm11, %v2557_v25, 1073741824  ;;  %v1181_v63 = vsel %vm1053_vm14, %v2549_v8, 1073741824 }
 0x1ba   :  { %v902_v36 = vpop.xlane.xlu1 %901  ;;  %v1340_v49 = vsel %vm1339_vm15, %v1179_v56, %v1180_v12  ;;  %v2582_v50 = vcvt.s32.f32 %v1306_v55  ;;  %vm1323_vm5 = vcmp.lt.s32.totalorder %v1322_v52, %v1178_v61  ;;  %v1182_v24 = vsel %vm2028_vm1, %v2557_v25, 1073741824 }
 0x1bb   :  { %vm1055_vm2 = vcmp.eq.f32.partialorder %v2283_v3, %v902_v36  ;;  %vm1056_vm3 = vcmp.eq.f32.partialorder %v2285_v4, %v902_v36  ;;  %vm1341_vm6 = vcmp.lt.s32.totalorder %v1340_v49, %v1181_v63  ;;  %vm1057_vm7 = vcmp.eq.f32.partialorder %v2281_v2, %v902_v36 }
 0x1bc   :  { %v1183_v43 = vsel %vm1055_vm2, %v2543_v59, 1073741824  ;;  %v1184_v62 = vsel %vm1056_vm3, %v2546_v48, 1073741824  ;;  %1309 = vmin.xlane.f32.xlu0 %v2582_v50  ;;  %v2586_v4 = vsel %vm1323_vm5, %v1322_v52, %v1178_v61  ;;  %v1342_v32 = vsel %vm1341_vm6, %v1340_v49, %v1181_v63 }
 0x1bd   :  { %vm1359_vm4 = vcmp.lt.s32.totalorder %v1183_v43, %v1184_v62  ;;  %vm2029_vm8 = vcmp.eq.f32.partialorder %v902_v36, -inf  ;;  %v1326_v56 = vshra.s32 %v2586_v4, 16  ;;  %v1185_v55 = vsel %vm1057_vm7, %v2549_v8, 1073741824 }
 0x1be   :  { %v907_v3 = vpop.xlane.xlu0 %906  ;;  %v1360_v51 = vsel %vm1359_vm4, %v1183_v43, %v1184_v62  ;;  %v1186_v44 = vsel %vm2029_vm8, %v2557_v25, 1073741824  ;;  %vm1343_vm0 = vcmp.lt.s32.totalorder %v1342_v32, %v1182_v24 }
 0x1bf   :  { %vm1059_vm9 = vcmp.eq.f32.partialorder %v2291_v9, %v907_v3  ;;  %vm1060_vm10 = vcmp.eq.f32.partialorder %v2295_v11, %v907_v3  ;;  %vm1061_vm11 = vcmp.eq.f32.partialorder %v2293_v10, %v907_v3  ;;  %v2599_v9 = vcvt.s32.f32 %v1326_v56 }
 0x1c0   :  { %v1187_v54 = vsel %vm1059_vm9, %v2543_v59, 1073741824  ;;  %v1188_v2 = vsel %vm1060_vm10, %v2546_v48, 1073741824  ;;  %v912_v12 = vpop.xlane.xlu1 %911  ;;  %v1189_v52 = vsel %vm1061_vm11, %v2549_v8, 1073741824  ;;  %vm1361_vm1 = vcmp.lt.s32.totalorder %v1360_v51, %v1185_v55 }
 0x1c1   :  { %vm1379_vm12 = vcmp.lt.s32.totalorder %v1187_v54, %v1188_v2  ;;  %vm1063_vm13 = vcmp.eq.f32.partialorder %v2301_v15, %v912_v12  ;;  %vm1064_vm14 = vcmp.eq.f32.partialorder %v2303_v16, %v912_v12  ;;  %3443 = vst [vmem:[#allocation52_spill] sm:$0xff] %v2599_v9  ;;  %1329 = vmin.xlane.f32.xlu1 %v2599_v9  ;;  %vm2030_vm3 = vcmp.eq.f32.partialorder %v907_v3, -inf }
 0x1c2   :  { %v1191_v11 = vsel %vm1063_vm13, %v2543_v59, 1073741824  ;;  %v1192_v10 = vsel %vm1064_vm14, %v2546_v48, 1073741824  ;;  %vm1065_vm2 = vcmp.eq.f32.partialorder %v2299_v14, %v912_v12  ;;  %v2608_v15 = vsel %vm1343_vm0, %v1342_v32, %v1182_v24 }
 0x1c3   :  { %vm1399_vm15 = vcmp.lt.s32.totalorder %v1191_v11, %v1192_v10  ;;  %v1362_v16 = vsel %vm1361_vm1, %v1360_v51, %v1185_v55  ;;  %v1380_v49 = vsel %vm1379_vm12, %v1187_v54, %v1188_v2  ;;  %v1346_v61 = vshra.s32 %v2608_v15, 16 }
 0x1c4   :  { %vm1363_vm4 = vcmp.lt.s32.totalorder %v1362_v16, %v1186_v44  ;;  %vm1381_vm5 = vcmp.lt.s32.totalorder %v1380_v49, %v1189_v52  ;;  %vm2031_vm6 = vcmp.eq.f32.partialorder %v912_v12, -inf  ;;  %v1400_v62 = vsel %vm1399_vm15, %v1191_v11, %v1192_v10 }
 0x1c5   :  { %v2611_v63 = vsel %vm1363_vm4, %v1362_v16, %v1186_v44  ;;  %v1382_v43 = vsel %vm1381_vm5, %v1380_v49, %v1189_v52  ;;  %v1193_v56 = vsel %vm1065_vm2, %v2549_v8, 1073741824  ;;  %v2615_v9 = vcvt.s32.f32 %v1346_v61 }
 0x1c6   :  { %v917_v36 = vpop.xlane.xlu0 %916  ;;  %v1190_v24 = vsel %vm2030_vm3, %v2557_v25, 1073741824  ;;  %v1366_v54 = vshra.s32 %v2611_v63, 16  ;;  %v1194_v2 = vsel %vm2031_vm6, %v2557_v25, 1073741824  ;;  %vm1401_vm1 = vcmp.lt.s32.totalorder %v1400_v62, %v1193_v56 }
 0x1c7   :  { %vm1067_vm7 = vcmp.eq.f32.partialorder %v2311_v22, %v917_v36  ;;  %vm1068_vm8 = vcmp.eq.f32.partialorder %v2313_v23, %v917_v36  ;;  %vm1069_vm9 = vcmp.eq.f32.partialorder %v2309_v21, %v917_v36  ;;  %1349 = vmin.xlane.f32.xlu0 %v2615_v9  ;;  %vm2032_vm13 = vcmp.eq.f32.partialorder %v917_v36, -inf }
 0x1c8   :  { %v1195_v14 = vsel %vm1067_vm7, %v2543_v59, 1073741824  ;;  %v1196_v32 = vsel %vm1068_vm8, %v2546_v48, 1073741824  ;;  %v922_v51 = vpop.xlane.xlu1 %921  ;;  %v2632_v55 = vcvt.s32.f32 %v1366_v54  ;;  %vm1383_vm0 = vcmp.lt.s32.totalorder %v1382_v43, %v1190_v24 }
 0x1c9   :  { %vm1419_vm10 = vcmp.lt.s32.totalorder %v1195_v14, %v1196_v32  ;;  %vm1071_vm11 = vcmp.eq.f32.partialorder %v2317_v26, %v922_v51  ;;  %vm1072_vm12 = vcmp.eq.f32.partialorder %v2321_v28, %v922_v51  ;;  %vm1073_vm14 = vcmp.eq.f32.partialorder %v2319_v27, %v922_v51 }
 0x1ca   :  { %v1199_v22 = vsel %vm1071_vm11, %v2543_v59, 1073741824  ;;  %v1200_v23 = vsel %vm1072_vm12, %v2546_v48, 1073741824  ;;  %v1197_v26 = vsel %vm1069_vm9, %v2549_v8, 1073741824  ;;  %v2638_v3 = vsel %vm1383_vm0, %v1382_v43, %v1190_v24  ;;  %1369 = vmin.xlane.f32.xlu1 %v2632_v55 }
 0x1cb   :  { %vm1439_vm15 = vcmp.lt.s32.totalorder %v1199_v22, %v1200_v23  ;;  %v1420_v28 = vsel %vm1419_vm10, %v1195_v14, %v1196_v32  ;;  %vm2033_vm2 = vcmp.eq.f32.partialorder %v922_v51, -inf  ;;  %v1386_v12 = vshra.s32 %v2638_v3, 16 }
 0x1cc   :  { %v1402_v11 = vsel %vm1401_vm1, %v1400_v62, %v1193_v56  ;;  %vm1421_vm3 = vcmp.lt.s32.totalorder %v1420_v28, %v1197_v26  ;;  %v1201_v10 = vsel %vm1073_vm14, %v2549_v8, 1073741824  ;;  %v1440_v52 = vsel %vm1439_vm15, %v1199_v22, %v1200_v23 }
 0x1cd   :  { %vm1403_vm4 = vcmp.lt.s32.totalorder %v1402_v11, %v1194_v2  ;;  %v1422_v44 = vsel %vm1421_vm3, %v1420_v28, %v1197_v26  ;;  %v2643_v16 = vcvt.s32.f32 %v1386_v12  ;;  %v1198_v62 = vsel %vm2032_vm13, %v2557_v25, 1073741824 }
 0x1ce   :  { %v927_v27 = vpop.xlane.xlu0 %926  ;;  %v2645_v21 = vsel %vm1403_vm4, %v1402_v11, %v1194_v2  ;;  %vm1423_vm13 = vcmp.lt.s32.totalorder %v1422_v44, %v1198_v62  ;;  %vm1441_vm0 = vcmp.lt.s32.totalorder %v1440_v52, %v1201_v10 }
 0x1cf   :  { %vm1075_vm5 = vcmp.eq.f32.partialorder %v2329_v34, %v927_v27  ;;  %vm1076_vm6 = vcmp.eq.f32.partialorder %v2331_v35, %v927_v27  ;;  %v1406_v49 = vshra.s32 %v2645_v21, 16  ;;  %vm1077_vm7 = vcmp.eq.f32.partialorder %v2327_v33, %v927_v27  ;;  %1389 = vmin.xlane.f32.xlu0 %v2643_v16 }
 0x1d0   :  { %v1203_v61 = vsel %vm1075_vm5, %v2543_v59, 1073741824  ;;  %v932_v43 = vpop.xlane.xlu1 %931  ;;  %v1204_v56 = vsel %vm1076_vm6, %v2546_v48, 1073741824  ;;  %v1202_v34 = vsel %vm2033_vm2, %v2557_v25, 1073741824  ;;  %vm2034_vm10 = vcmp.eq.f32.partialorder %v927_v27, -inf }
 0x1d1   :  { %vm1079_vm8 = vcmp.eq.f32.partialorder %v2335_v38, %v932_v43  ;;  %vm1080_vm9 = vcmp.eq.f32.partialorder %v2339_v40, %v932_v43  ;;  %v2660_v35 = vcvt.s32.f32 %v1406_v49  ;;  %vm1459_vm11 = vcmp.lt.s32.totalorder %v1203_v61, %v1204_v56 }
 0x1d2   :  { %vm1081_vm12 = vcmp.eq.f32.partialorder %v2337_v39, %v932_v43  ;;  %v1205_v33 = vsel %vm1077_vm7, %v2549_v8, 1073741824  ;;  %v1207_v36 = vsel %vm1079_vm8, %v2543_v59, 1073741824  ;;  %v1208_v14 = vsel %vm1080_vm9, %v2546_v48, 1073741824 }
 0x1d3   :  { %1409 = vmin.xlane.f32.xlu1 %v2660_v35  ;;  %vm2035_vm14 = vcmp.eq.f32.partialorder %v932_v43, -inf  ;;  %vm1479_vm15 = vcmp.lt.s32.totalorder %v1207_v36, %v1208_v14  ;;  %v2667_v38 = vsel %vm1423_vm13, %v1422_v44, %v1198_v62  ;;  %v1209_v40 = vsel %vm1081_vm12, %v2549_v8, 1073741824 }
 0x1d4   :  { %v1426_v32 = vshra.s32 %v2667_v38, 16  ;;  %v1442_v51 = vsel %vm1441_vm0, %v1440_v52, %v1201_v10  ;;  %v1460_v39 = vsel %vm1459_vm11, %v1203_v61, %v1204_v56  ;;  %v1206_v54 = vsel %vm2034_vm10, %v2557_v25, 1073741824 }
 0x1d5   :  { %vm1443_vm1 = vcmp.lt.s32.totalorder %v1442_v51, %v1202_v34  ;;  %vm1461_vm2 = vcmp.lt.s32.totalorder %v1460_v39, %v1205_v33  ;;  %v1480_v22 = vsel %vm1479_vm15, %v1207_v36, %v1208_v14  ;;  %v1210_v11 = vsel %vm2035_vm14, %v2557_v25, 1073741824 }
 0x1d6   :  { %v937_v24 = vpop.xlane.xlu0 %936  ;;  %v2673_v23 = vcvt.s32.f32 %v1426_v32  ;;  %v2675_v2 = vsel %vm1443_vm1, %v1442_v51, %v1202_v34  ;;  %v1462_v44 = vsel %vm1461_vm2, %v1460_v39, %v1205_v33  ;;  %vm1481_vm14 = vcmp.lt.s32.totalorder %v1480_v22, %v1209_v40 }
 0x1d7   :  { %vm1083_vm3 = vcmp.eq.f32.partialorder %v2347_v46, %v937_v24  ;;  %vm1084_vm4 = vcmp.eq.f32.partialorder %v2349_v47, %v937_v24  ;;  %v1446_v26 = vshra.s32 %v2675_v2, 16  ;;  %vm1085_vm5 = vcmp.eq.f32.partialorder %v2345_v45, %v937_v24 }
 0x1d8   :  { %v1211_v28 = vsel %vm1083_vm3, %v2543_v59, 1073741824  ;;  %v942_v12 = vpop.xlane.xlu1 %941  ;;  %1429 = vmin.xlane.f32.xlu0 %v2673_v23  ;;  %vm2036_vm6 = vcmp.eq.f32.partialorder %v937_v24, -inf  ;;  %v1212_v10 = vsel %vm1084_vm4, %v2546_v48, 1073741824  ;;  %v1213_v47 = vsel %vm1085_vm5, %v2549_v8, 1073741824 }
 0x1d9   :  { %vm1087_vm7 = vcmp.eq.f32.partialorder %v2353_v53, %v942_v12  ;;  %vm1088_vm8 = vcmp.eq.f32.partialorder %v2357_v58, %v942_v12  ;;  %v2688_v46 = vcvt.s32.f32 %v1446_v26  ;;  %vm1499_vm9 = vcmp.lt.s32.totalorder %v1211_v28, %v1212_v10 }
 0x1da   :  { %vm1089_vm10 = vcmp.eq.f32.partialorder %v2355_v57, %v942_v12  ;;  %vm2037_vm11 = vcmp.eq.f32.partialorder %v942_v12, -inf  ;;  %v1215_v45 = vsel %vm1087_vm7, %v2543_v59, 1073741824  ;;  %v1216_v27 = vsel %vm1088_vm8, %v2546_v48, 1073741824 }
 0x1db   :  { %1449 = vmin.xlane.f32.xlu1 %v2688_v46  ;;  %v1217_v53 = vsel %vm1089_vm10, %v2549_v8, 1073741824  ;;  %vm1519_vm12 = vcmp.lt.s32.totalorder %v1215_v45, %v1216_v27  ;;  %vm1463_vm13 = vcmp.lt.s32.totalorder %v1462_v44, %v1206_v54  ;;  %v1482_v52 = vsel %vm1481_vm14, %v1480_v22, %v1209_v40 }
 0x1dc   :  { %v2697_v58 = vsel %vm1463_vm13, %v1462_v44, %v1206_v54  ;;  %v1214_v57 = vsel %vm2036_vm6, %v2557_v25, 1073741824  ;;  %v1500_v49 = vsel %vm1499_vm9, %v1211_v28, %v1212_v10  ;;  %vm1483_vm15 = vcmp.lt.s32.totalorder %v1482_v52, %v1210_v11 }
 0x1dd   :  { %v1466_v61 = vshra.s32 %v2697_v58, 16  ;;  %vm1501_vm0 = vcmp.lt.s32.totalorder %v1500_v49, %v1213_v47  ;;  %v1520_v62 = vsel %vm1519_vm12, %v1215_v45, %v1216_v27  ;;  %v2702_v56 = vsel %vm1483_vm15, %v1482_v52, %v1210_v11 }
 0x1de   :  { %v947_v43 = vpop.xlane.xlu0 %946  ;;  %v1486_v33 = vshra.s32 %v2702_v56, 16  ;;  %v1218_v40 = vsel %vm2037_vm11, %v2557_v25, 1073741824  ;;  %v1502_v39 = vsel %vm1501_vm0, %v1500_v49, %v1213_v47  ;;  %vm1521_vm12 = vcmp.lt.s32.totalorder %v1520_v62, %v1217_v53 }
 0x1df   :  { %vm1091_vm1 = vcmp.eq.f32.partialorder %v2365_v6, %v947_v43  ;;  %vm1092_vm2 = vcmp.eq.f32.partialorder %v2367_v7, %v947_v43  ;;  %vm1093_vm3 = vcmp.eq.f32.partialorder %v2363_v5, %v947_v43  ;;  %v2707_v34 = vcvt.s32.f32 %v1466_v61 }
 0x1e0   :  { %v1219_v36 = vsel %vm1091_vm1, %v2543_v59, 1073741824  ;;  %v952_v14 = vpop.xlane.xlu1 %951  ;;  %vm2038_vm4 = vcmp.eq.f32.partialorder %v947_v43, -inf  ;;  %v1220_v32 = vsel %vm1092_vm2, %v2546_v48, 1073741824  ;;  %v2717_v5 = vcvt.s32.f32 %v1486_v33 }
 0x1e1   :  { %vm1095_vm5 = vcmp.eq.f32.partialorder %v2371_v13, %v952_v14  ;;  %vm1096_vm6 = vcmp.eq.f32.partialorder %v2375_v18, %v952_v14  ;;  %1469 = vmin.xlane.f32.xlu0 %v2707_v34  ;;  %v1221_v6 = vsel %vm1093_vm3, %v2549_v8, 1073741824  ;;  %vm1539_vm7 = vcmp.lt.s32.totalorder %v1219_v36, %v1220_v32 }
 0x1e2   :  { %vm1097_vm8 = vcmp.eq.f32.partialorder %v2373_v17, %v952_v14  ;;  %vm2039_vm9 = vcmp.eq.f32.partialorder %v952_v14, -inf  ;;  %v1223_v7 = vsel %vm1095_vm5, %v2543_v59, 1073741824  ;;  %v1224_v51 = vsel %vm1096_vm6, %v2546_v48, 1073741824  ;;  %1489 = vmin.xlane.f32.xlu1 %v2717_v5  ;;  %v3445_v14 = vld [vmem:[#allocation8_spill] sm:$0xff] }
 0x1e3   :  { %v1225_v13 = vsel %vm1097_vm8, %v2549_v8, 1073741824  ;;  %vm1559_vm10 = vcmp.lt.s32.totalorder %v1223_v7, %v1224_v51  ;;  %vm1503_vm11 = vcmp.lt.s32.totalorder %v1502_v39, %v1214_v57  ;;  %v1522_v24 = vsel %vm1521_vm12, %v1520_v62, %v1217_v53 }
 0x1e4   :  { %v2726_v18 = vsel %vm1503_vm11, %v1502_v39, %v1214_v57  ;;  %v1222_v17 = vsel %vm2038_vm4, %v2557_v25, 1073741824  ;;  %v1540_v54 = vsel %vm1539_vm7, %v1219_v36, %v1220_v32  ;;  %vm1523_vm13 = vcmp.lt.s32.totalorder %v1522_v24, %v1218_v40  ;;  %v3444_v36 = vld [vmem:[#allocation9_spill] sm:$0xff] }
 0x1e5   :  { %v1506_v22 = vshra.s32 %v2726_v18, 16  ;;  %vm1541_vm14 = vcmp.lt.s32.totalorder %v1540_v54, %v1221_v6  ;;  %v1560_v28 = vsel %vm1559_vm10, %v1223_v7, %v1224_v51  ;;  %v2731_v12 = vsel %vm1523_vm13, %v1522_v24, %v1218_v40 }
 0x1e6   :  { %v957_v26 = vpop.xlane.xlu0 %956  ;;  %v1526_v10 = vshra.s32 %v2731_v12, 16  ;;  %v1226_v27 = vsel %vm2039_vm9, %v2557_v25, 1073741824  ;;  %v1542_v52 = vsel %vm1541_vm14, %v1540_v54, %v1221_v6  ;;  %vm1561_vm10 = vcmp.lt.s32.totalorder %v1560_v28, %v1225_v13  ;;  %v3448_v54 = vld [vmem:[#allocation11_spill] sm:$0xff] }
 0x1e7   :  { %vm1099_vm15 = vcmp.eq.f32.partialorder %v2383_v30, %v957_v26  ;;  %vm1100_vm0 = vcmp.eq.f32.partialorder %v2385_v31, %v957_v26  ;;  %vm1101_vm1 = vcmp.eq.f32.partialorder %v2381_v29, %v957_v26  ;;  %v2736_v11 = vcvt.s32.f32 %v1506_v22 }
 0x1e8   :  { %v1227_v47 = vsel %vm1099_vm15, %v2543_v59, 1073741824  ;;  %v962_v45 = vpop.xlane.xlu1 %961  ;;  %vm2040_vm2 = vcmp.eq.f32.partialorder %v957_v26, -inf  ;;  %v1228_v44 = vsel %vm1100_vm0, %v2546_v48, 1073741824  ;;  %v2746_v29 = vcvt.s32.f32 %v1526_v10 }
 0x1e9   :  { %vm1103_vm3 = vcmp.eq.f32.partialorder %v2389_v37, %v962_v45  ;;  %vm1104_vm4 = vcmp.eq.f32.partialorder %v2393_v42, %v962_v45  ;;  %1509 = vmin.xlane.f32.xlu0 %v2736_v11  ;;  %v1229_v30 = vsel %vm1101_vm1, %v2549_v8, 1073741824  ;;  %vm1579_vm5 = vcmp.lt.s32.totalorder %v1227_v47, %v1228_v44 }
 0x1ea   :  { %vm1105_vm6 = vcmp.eq.f32.partialorder %v2391_v41, %v962_v45  ;;  %vm2041_vm7 = vcmp.eq.f32.partialorder %v962_v45, -inf  ;;  %v1231_v31 = vsel %vm1103_vm3, %v2543_v59, 1073741824  ;;  %v1232_v53 = vsel %vm1104_vm4, %v2546_v48, 1073741824  ;;  %1529 = vmin.xlane.f32.xlu1 %v2746_v29 }
 0x1eb   :  { %v1233_v37 = vsel %vm1105_vm6, %v2549_v8, 1073741824  ;;  %vm1599_vm8 = vcmp.lt.s32.totalorder %v1231_v31, %v1232_v53  ;;  %vm1543_vm9 = vcmp.lt.s32.totalorder %v1542_v52, %v1222_v17  ;;  %v1562_v57 = vsel %vm1561_vm10, %v1560_v28, %v1225_v13  ;;  %v3446_v13 = vld [vmem:[#allocation10_spill] sm:$0xff] }
 0x1ec   :  { %v2755_v42 = vsel %vm1543_vm9, %v1542_v52, %v1222_v17  ;;  %v1230_v41 = vsel %vm2040_vm2, %v2557_v25, 1073741824  ;;  %v1580_v49 = vsel %vm1579_vm5, %v1227_v47, %v1228_v44  ;;  %vm1563_vm11 = vcmp.lt.s32.totalorder %v1562_v57, %v1226_v27 }
 0x1ed   :  { %v1546_v61 = vshra.s32 %v2755_v42, 16  ;;  %vm1581_vm12 = vcmp.lt.s32.totalorder %v1580_v49, %v1229_v30  ;;  %v1600_v62 = vsel %vm1599_vm8, %v1231_v31, %v1232_v53  ;;  %v2760_v33 = vsel %vm1563_vm11, %v1562_v57, %v1226_v27  ;;  %v3449_v57 = vld [vmem:[#allocation14_spill] sm:$0xff] }
 0x1ee   :  { %v967_v43 = vpop.xlane.xlu0 %966  ;;  %v1566_v32 = vshra.s32 %v2760_v33, 16  ;;  %v1234_v51 = vsel %vm2041_vm7, %v2557_v25, 1073741824  ;;  %v1582_v28 = vsel %vm1581_vm12, %v1580_v49, %v1229_v30  ;;  %vm1601_vm8 = vcmp.lt.s32.totalorder %v1600_v62, %v1233_v37  ;;  %v3450_v49 = vld [vmem:[#allocation15_spill] sm:$0xff] }
 0x1ef   :  { %vm1107_vm13 = vcmp.eq.f32.partialorder %v2401_v60, %v967_v43  ;;  %vm1108_vm14 = vcmp.eq.f32.partialorder %v3444_v36, %v967_v43  ;;  %vm1109_vm15 = vcmp.eq.f32.partialorder %v3445_v14, %v967_v43  ;;  %v2765_v40 = vcvt.s32.f32 %v1546_v61  ;;  %v3447_v60 = vld [vmem:[#allocation12_spill] sm:$0xff]  ;;  %v3451_v61 = vld [vmem:[#allocation13_spill] sm:$0xff] }
 0x1f0   :  { %v1235_v6 = vsel %vm1107_vm13, %v2543_v59, 1073741824  ;;  %v972_v7 = vpop.xlane.xlu1 %971  ;;  %vm2042_vm0 = vcmp.eq.f32.partialorder %v967_v43, -inf  ;;  %v1236_v39 = vsel %vm1108_vm14, %v2546_v48, 1073741824  ;;  %v2775_v24 = vcvt.s32.f32 %v1566_v32  ;;  %v3452_v32 = vld [vmem:[#allocation16_spill] sm:$0xff] }
 0x1f1   :  { %vm1111_vm1 = vcmp.eq.f32.partialorder %v3446_v13, %v972_v7  ;;  %vm1112_vm2 = vcmp.eq.f32.partialorder %v3447_v60, %v972_v7  ;;  %1549 = vmin.xlane.f32.xlu0 %v2765_v40  ;;  %v1237_v17 = vsel %vm1109_vm15, %v2549_v8, 1073741824  ;;  %vm1619_vm3 = vcmp.lt.s32.totalorder %v1235_v6, %v1236_v39  ;;  %v3454_v13 = vld [vmem:[#allocation17_spill] sm:$0xff] }
 0x1f2   :  { %vm1113_vm4 = vcmp.eq.f32.partialorder %v3448_v54, %v972_v7  ;;  %vm2043_vm5 = vcmp.eq.f32.partialorder %v972_v7, -inf  ;;  %v1239_v22 = vsel %vm1111_vm1, %v2543_v59, 1073741824  ;;  %v1240_v26 = vsel %vm1112_vm2, %v2546_v48, 1073741824  ;;  %1569 = vmin.xlane.f32.xlu1 %v2775_v24 }
 0x1f3   :  { %v1241_v10 = vsel %vm1113_vm4, %v2549_v8, 1073741824  ;;  %vm1639_vm6 = vcmp.lt.s32.totalorder %v1239_v22, %v1240_v26  ;;  %vm1583_vm7 = vcmp.lt.s32.totalorder %v1582_v28, %v1230_v41  ;;  %v1602_v45 = vsel %vm1601_vm8, %v1600_v62, %v1233_v37 }
 0x1f4   :  { %v2784_v47 = vsel %vm1583_vm7, %v1582_v28, %v1230_v41  ;;  %v1238_v27 = vsel %vm2042_vm0, %v2557_v25, 1073741824  ;;  %v1620_v44 = vsel %vm1619_vm3, %v1235_v6, %v1236_v39  ;;  %vm1603_vm9 = vcmp.lt.s32.totalorder %v1602_v45, %v1234_v51  ;;  %v3453_v6 = vld [vmem:[#allocation18_spill] sm:$0xff] }
 0x1f5   :  { %v1586_v31 = vshra.s32 %v2784_v47, 16  ;;  %vm1621_vm10 = vcmp.lt.s32.totalorder %v1620_v44, %v1237_v17  ;;  %v1640_v30 = vsel %vm1639_vm6, %v1239_v22, %v1240_v26  ;;  %v2789_v52 = vsel %vm1603_vm9, %v1602_v45, %v1234_v51 }
 0x1f6   :  { %v977_v53 = vpop.xlane.xlu0 %976  ;;  %v1606_v37 = vshra.s32 %v2789_v52, 16  ;;  %v1242_v36 = vsel %vm2043_vm5, %v2557_v25, 1073741824  ;;  %v1622_v54 = vsel %vm1621_vm10, %v1620_v44, %v1237_v17  ;;  %vm1641_vm6 = vcmp.lt.s32.totalorder %v1640_v30, %v1241_v10 }
 0x1f7   :  { %vm1115_vm11 = vcmp.eq.f32.partialorder %v3449_v57, %v977_v53  ;;  %vm1116_vm12 = vcmp.eq.f32.partialorder %v3450_v49, %v977_v53  ;;  %vm1117_vm13 = vcmp.eq.f32.partialorder %v3451_v61, %v977_v53  ;;  %v2794_v41 = vcvt.s32.f32 %v1586_v31  ;;  %v3455_v61 = vld [vmem:[#allocation20_spill] sm:$0xff] }
 0x1f8   :  { %v1243_v43 = vsel %vm1115_vm11, %v2543_v59, 1073741824  ;;  %v982_v62 = vpop.xlane.xlu1 %981  ;;  %vm2044_vm14 = vcmp.eq.f32.partialorder %v977_v53, -inf  ;;  %v1244_v14 = vsel %vm1116_vm12, %v2546_v48, 1073741824  ;;  %v2804_v51 = vcvt.s32.f32 %v1606_v37  ;;  %v3456_v37 = vld [vmem:[#allocation21_spill] sm:$0xff] }
 0x1f9   :  { %vm1119_vm15 = vcmp.eq.f32.partialorder %v3452_v32, %v982_v62  ;;  %vm1120_vm0 = vcmp.eq.f32.partialorder %v3453_v6, %v982_v62  ;;  %1589 = vmin.xlane.f32.xlu0 %v2794_v41  ;;  %v1245_v39 = vsel %vm1117_vm13, %v2549_v8, 1073741824  ;;  %vm1659_vm1 = vcmp.lt.s32.totalorder %v1243_v43, %v1244_v14  ;;  %v3457_v32 = vld [vmem:[#allocation19_spill] sm:$0xff]  ;;  %v3460_v6 = vld [vmem:[#allocation24_spill] sm:$0xff] }
 0x1fa   :  { %vm1121_vm2 = vcmp.eq.f32.partialorder %v3454_v13, %v982_v62  ;;  %vm2045_vm3 = vcmp.eq.f32.partialorder %v982_v62, -inf  ;;  %v1247_v7 = vsel %vm1119_vm15, %v2543_v59, 1073741824  ;;  %v1248_v60 = vsel %vm1120_vm0, %v2546_v48, 1073741824  ;;  %1609 = vmin.xlane.f32.xlu1 %v2804_v51 }
 0x1fb   :  { %v1249_v22 = vsel %vm1121_vm2, %v2549_v8, 1073741824  ;;  %vm1679_vm4 = vcmp.lt.s32.totalorder %v1247_v7, %v1248_v60  ;;  %vm1623_vm5 = vcmp.lt.s32.totalorder %v1622_v54, %v1238_v27  ;;  %v1642_v28 = vsel %vm1641_vm6, %v1640_v30, %v1241_v10 }
 0x1fc   :  { %v2813_v26 = vsel %vm1623_vm5, %v1622_v54, %v1238_v27  ;;  %v1246_v45 = vsel %vm2044_vm14, %v2557_v25, 1073741824  ;;  %v1660_v31 = vsel %vm1659_vm1, %v1243_v43, %v1244_v14  ;;  %vm1643_vm7 = vcmp.lt.s32.totalorder %v1642_v28, %v1242_v36  ;;  %v3459_v14 = vld [vmem:[#allocation22_spill] sm:$0xff] }
 0x1fd   :  { %v1626_v57 = vshra.s32 %v2813_v26, 16  ;;  %vm1661_vm8 = vcmp.lt.s32.totalorder %v1660_v31, %v1245_v39  ;;  %v1680_v17 = vsel %vm1679_vm4, %v1247_v7, %v1248_v60  ;;  %v2818_v44 = vsel %vm1643_vm7, %v1642_v28, %v1242_v36  ;;  %v3462_v60 = vld [vmem:[#allocation23_spill] sm:$0xff] }
 0x1fe   :  { %v987_v49 = vpop.xlane.xlu0 %986  ;;  %v1646_v10 = vshra.s32 %v2818_v44, 16  ;;  %v1250_v43 = vsel %vm2045_vm3, %v2557_v25, 1073741824  ;;  %v1662_v28 = vsel %vm1661_vm8, %v1660_v31, %v1245_v39  ;;  %vm1681_vm4 = vcmp.lt.s32.totalorder %v1680_v17, %v1249_v22 }
 0x1ff   :  { %vm1123_vm9 = vcmp.eq.f32.partialorder %v3455_v61, %v987_v49  ;;  %vm1124_vm10 = vcmp.eq.f32.partialorder %v3456_v37, %v987_v49  ;;  %vm1125_vm11 = vcmp.eq.f32.partialorder %v3457_v32, %v987_v49  ;;  %v2823_v27 = vcvt.s32.f32 %v1626_v57 }
 0x200   :  { %v1251_v53 = vsel %vm1123_vm9, %v2543_v59, 1073741824  ;;  %v992_v30 = vpop.xlane.xlu1 %991  ;;  %vm2046_vm12 = vcmp.eq.f32.partialorder %v987_v49, -inf  ;;  %v1252_v36 = vsel %vm1124_vm10, %v2546_v48, 1073741824  ;;  %v2833_v13 = vcvt.s32.f32 %v1646_v10 }
 0x201   :  { %3458 = vst [vmem:[#allocation9_spill] sm:$0xff] %v2823_v27  ;;  %vm1127_vm13 = vcmp.eq.f32.partialorder %v3459_v14, %v992_v30  ;;  %vm1128_vm14 = vcmp.eq.f32.partialorder %v3460_v6, %v992_v30  ;;  %1629 = vmin.xlane.f32.xlu0 %v2823_v27  ;;  %v1253_v7 = vsel %vm1125_vm11, %v2549_v8, 1073741824  ;;  %vm1699_vm15 = vcmp.lt.s32.totalorder %v1251_v53, %v1252_v36  ;;  %v3467_v27 = vld [vmem:[#allocation25_spill] sm:$0xff] }
 0x202   :  { %3461 = vst [vmem:[#allocation8_spill] sm:$0xff] %v2833_v13  ;;  %vm1129_vm0 = vcmp.eq.f32.partialorder %v3462_v60, %v992_v30  ;;  %vm2047_vm1 = vcmp.eq.f32.partialorder %v992_v30, -inf  ;;  %v1255_v62 = vsel %vm1127_vm13, %v2543_v59, 1073741824  ;;  %v1256_v54 = vsel %vm1128_vm14, %v2546_v48, 1073741824  ;;  %1649 = vmin.xlane.f32.xlu1 %v2833_v13  ;;  %v3465_v60 = vld [vmem:[#allocation26_spill] sm:$0xff]  ;;  %v3466_v13 = vld [vmem:[#allocation27_spill] sm:$0xff] }
 0x203   :  { %v1257_v57 = vsel %vm1129_vm0, %v2549_v8, 1073741824  ;;  %vm1719_vm2 = vcmp.lt.s32.totalorder %v1255_v62, %v1256_v54  ;;  %vm1663_vm3 = vcmp.lt.s32.totalorder %v1662_v28, %v1246_v45  ;;  %v1682_v37 = vsel %vm1681_vm4, %v1680_v17, %v1249_v22 }
 0x204   :  { %v2842_v61 = vsel %vm1663_vm3, %v1662_v28, %v1246_v45  ;;  %v1254_v32 = vsel %vm2046_vm12, %v2557_v25, 1073741824  ;;  %v1700_v10 = vsel %vm1699_vm15, %v1251_v53, %v1252_v36  ;;  %vm1683_vm5 = vcmp.lt.s32.totalorder %v1682_v37, %v1250_v43  ;;  %v3469_v36 = vld [vmem:[#allocation28_spill] sm:$0xff] }
 0x205   :  { %3463 = vst [vmem:[#allocation10_spill] sm:$0xff] %v2842_v61  ;;  %v1666_v14 = vshra.s32 %v2842_v61, 16  ;;  %vm1701_vm6 = vcmp.lt.s32.totalorder %v1700_v10, %v1253_v7  ;;  %v1720_v39 = vsel %vm1719_vm2, %v1255_v62, %v1256_v54  ;;  %v2847_v31 = vsel %vm1683_vm5, %v1682_v37, %v1250_v43  ;;  %v3470_v62 = vld [vmem:[#allocation30_spill] sm:$0xff]  ;;  %v3472_v54 = vld [vmem:[#allocation29_spill] sm:$0xff]  ;;  %v3477_v61 = vld [vmem:[#allocation31_spill] sm:$0xff] }
 0x206   :  { %v997_v6 = vpop.xlane.xlu0 %996  ;;  %3464 = vst [vmem:[#allocation12_spill] sm:$0xff] %v2847_v31  ;;  %v1686_v22 = vshra.s32 %v2847_v31, 16  ;;  %v1258_v53 = vsel %vm2047_vm1, %v2557_v25, 1073741824  ;;  %v1702_v37 = vsel %vm1701_vm6, %v1700_v10, %v1253_v7  ;;  %vm1721_vm2 = vcmp.lt.s32.totalorder %v1720_v39, %v1257_v57  ;;  %v3476_v31 = vld [vmem:[#allocation33_spill] sm:$0xff] }
 0x207   :  { %vm1131_vm7 = vcmp.eq.f32.partialorder %v3465_v60, %v997_v6  ;;  %vm1132_vm8 = vcmp.eq.f32.partialorder %v3466_v13, %v997_v6  ;;  %vm1133_vm9 = vcmp.eq.f32.partialorder %v3467_v27, %v997_v6  ;;  %v2852_v45 = vcvt.s32.f32 %v1666_v14 }
 0x208   :  { %v1259_v49 = vsel %vm1131_vm7, %v2543_v59, 1073741824  ;;  %v1002_v17 = vpop.xlane.xlu1 %1001  ;;  %vm2048_vm10 = vcmp.eq.f32.partialorder %v997_v6, -inf  ;;  %v1260_v43 = vsel %vm1132_vm8, %v2546_v48, 1073741824  ;;  %v2862_v27 = vcvt.s32.f32 %v1686_v22 }
 0x209   :  { %3468 = vst [vmem:[#allocation11_spill] sm:$0xff] %v2852_v45  ;;  %vm1135_vm11 = vcmp.eq.f32.partialorder %v3469_v36, %v1002_v17  ;;  %vm1136_vm12 = vcmp.eq.f32.partialorder %v3470_v62, %v1002_v17  ;;  %1669 = vmin.xlane.f32.xlu0 %v2852_v45  ;;  %v1261_v13 = vsel %vm1133_vm9, %v2549_v8, 1073741824  ;;  %vm1739_vm13 = vcmp.lt.s32.totalorder %v1259_v49, %v1260_v43 }
 0x20a   :  { %3471 = vst [vmem:[#allocation14_spill] sm:$0xff] %v2862_v27  ;;  %vm1137_vm14 = vcmp.eq.f32.partialorder %v3472_v54, %v1002_v17  ;;  %vm2049_vm15 = vcmp.eq.f32.partialorder %v1002_v17, -inf  ;;  %v1263_v30 = vsel %vm1135_vm11, %v2543_v59, 1073741824  ;;  %v1264_v28 = vsel %vm1136_vm12, %v2546_v48, 1073741824  ;;  %1689 = vmin.xlane.f32.xlu1 %v2862_v27  ;;  %v3475_v27 = vld [vmem:[#allocation32_spill] sm:$0xff] }
 0x20b   :  { %v1265_v14 = vsel %vm1137_vm14, %v2549_v8, 1073741824  ;;  %vm1759_vm0 = vcmp.lt.s32.totalorder %v1263_v30, %v1264_v28  ;;  %vm1703_vm1 = vcmp.lt.s32.totalorder %v1702_v37, %v1254_v32  ;;  %v1722_v22 = vsel %vm1721_vm2, %v1720_v39, %v1257_v57 }
 0x20c   :  { %v2871_v60 = vsel %vm1703_vm1, %v1702_v37, %v1254_v32  ;;  %v1262_v36 = vsel %vm2048_vm10, %v2557_v25, 1073741824  ;;  %v1740_v62 = vsel %vm1739_vm13, %v1259_v49, %v1260_v43  ;;  %vm1723_vm3 = vcmp.lt.s32.totalorder %v1722_v22, %v1258_v53  ;;  %v3479_v43 = vld [vmem:[#allocation34_spill] sm:$0xff] }
 0x20d   :  { %3473 = vst [vmem:[#allocation15_spill] sm:$0xff] %v2871_v60  ;;  %v1706_v54 = vshra.s32 %v2871_v60, 16  ;;  %vm1741_vm4 = vcmp.lt.s32.totalorder %v1740_v62, %v1261_v13  ;;  %v1760_v7 = vsel %vm1759_vm0, %v1263_v30, %v1264_v28  ;;  %v2876_v10 = vsel %vm1723_vm3, %v1722_v22, %v1258_v53  ;;  %v3482_v30 = vld [vmem:[#allocation35_spill] sm:$0xff]  ;;  %v3486_v60 = vld [vmem:[#allocation37_spill] sm:$0xff] }
 0x20e   :  { %v1007_v45 = vpop.xlane.xlu0 %1006  ;;  %3474 = vst [vmem:[#allocation13_spill] sm:$0xff] %v2876_v10  ;;  %v1726_v57 = vshra.s32 %v2876_v10, 16  ;;  %v1266_v49 = vsel %vm2049_vm15, %v2557_v25, 1073741824  ;;  %v1742_v37 = vsel %vm1741_vm4, %v1740_v62, %v1261_v13  ;;  %vm1761_vm0 = vcmp.lt.s32.totalorder %v1760_v7, %v1265_v14  ;;  %v3485_v10 = vld [vmem:[#allocation39_spill] sm:$0xff] }
 0x20f   :  { %vm1139_vm5 = vcmp.eq.f32.partialorder %v3475_v27, %v1007_v45  ;;  %vm1140_vm6 = vcmp.eq.f32.partialorder %v3476_v31, %v1007_v45  ;;  %vm1141_vm7 = vcmp.eq.f32.partialorder %v3477_v61, %v1007_v45  ;;  %v2881_v32 = vcvt.s32.f32 %v1706_v54  ;;  %v3480_v27 = vld [vmem:[#allocation36_spill] sm:$0xff] }
 0x210   :  { %v1267_v6 = vsel %vm1139_vm5, %v2543_v59, 1073741824  ;;  %v1012_v39 = vpop.xlane.xlu1 %1011  ;;  %vm2050_vm8 = vcmp.eq.f32.partialorder %v1007_v45, -inf  ;;  %v1268_v53 = vsel %vm1140_vm6, %v2546_v48, 1073741824  ;;  %v2891_v61 = vcvt.s32.f32 %v1726_v57 }
 0x211   :  { %3478 = vst [vmem:[#allocation16_spill] sm:$0xff] %v2881_v32  ;;  %vm1143_vm9 = vcmp.eq.f32.partialorder %v3479_v43, %v1012_v39  ;;  %vm1144_vm10 = vcmp.eq.f32.partialorder %v3480_v27, %v1012_v39  ;;  %1709 = vmin.xlane.f32.xlu0 %v2881_v32  ;;  %v1269_v31 = vsel %vm1141_vm7, %v2549_v8, 1073741824  ;;  %vm1779_vm11 = vcmp.lt.s32.totalorder %v1267_v6, %v1268_v53 }
 0x212   :  { %3481 = vst [vmem:[#allocation18_spill] sm:$0xff] %v2891_v61  ;;  %vm1145_vm12 = vcmp.eq.f32.partialorder %v3482_v30, %v1012_v39  ;;  %vm2051_vm13 = vcmp.eq.f32.partialorder %v1012_v39, -inf  ;;  %v1271_v17 = vsel %vm1143_vm9, %v2543_v59, 1073741824  ;;  %v1272_v28 = vsel %vm1144_vm10, %v2546_v48, 1073741824  ;;  %1729 = vmin.xlane.f32.xlu1 %v2891_v61  ;;  %v3484_v61 = vld [vmem:[#allocation38_spill] sm:$0xff] }
 0x213   :  { %v1273_v22 = vsel %vm1145_vm12, %v2549_v8, 1073741824  ;;  %vm1799_vm14 = vcmp.lt.s32.totalorder %v1271_v17, %v1272_v28  ;;  %vm1743_vm15 = vcmp.lt.s32.totalorder %v1742_v37, %v1262_v36  ;;  %v1762_v57 = vsel %vm1761_vm0, %v1760_v7, %v1265_v14 }
 0x214   :  { %v2900_v54 = vsel %vm1743_vm15, %v1742_v37, %v1262_v36  ;;  %v1270_v43 = vsel %vm2050_vm8, %v2557_v25, 1073741824  ;;  %v1780_v27 = vsel %vm1779_vm11, %v1267_v6, %v1268_v53  ;;  %vm1763_vm1 = vcmp.lt.s32.totalorder %v1762_v57, %v1266_v49  ;;  %v3488_v53 = vld [vmem:[#allocation40_spill] sm:$0xff] }
 0x215   :  { %v1746_v30 = vshra.s32 %v2900_v54, 16  ;;  %vm1781_vm2 = vcmp.lt.s32.totalorder %v1780_v27, %v1269_v31  ;;  %v1800_v13 = vsel %vm1799_vm14, %v1271_v17, %v1272_v28  ;;  %v2905_v62 = vsel %vm1763_vm1, %v1762_v57, %v1266_v49  ;;  %v3491_v17 = vld [vmem:[#allocation41_spill] sm:$0xff] }
 0x216   :  { %v1017_v32 = vpop.xlane.xlu0 %1016  ;;  %3483 = vst [vmem:[#allocation17_spill] sm:$0xff] %v2905_v62  ;;  %v1766_v45 = vshra.s32 %v2905_v62, 16  ;;  %v1274_v6 = vsel %vm2051_vm13, %v2557_v25, 1073741824  ;;  %v1782_v37 = vsel %vm1781_vm2, %v1780_v27, %v1269_v31  ;;  %vm1801_vm14 = vcmp.lt.s32.totalorder %v1800_v13, %v1273_v22  ;;  %v3494_v62 = vld [vmem:[#allocation44_spill] sm:$0xff] }
 0x217   :  { %vm1147_vm3 = vcmp.eq.f32.partialorder %v3484_v61, %v1017_v32  ;;  %vm1148_vm4 = vcmp.eq.f32.partialorder %v3485_v10, %v1017_v32  ;;  %vm1149_vm5 = vcmp.eq.f32.partialorder %v3486_v60, %v1017_v32  ;;  %v2910_v36 = vcvt.s32.f32 %v1746_v30  ;;  %v3489_v61 = vld [vmem:[#allocation42_spill] sm:$0xff] }
 0x218   :  { %v1275_v14 = vsel %vm1147_vm3, %v2543_v59, 1073741824  ;;  %v1022_v7 = vpop.xlane.xlu1 %1021  ;;  %vm2052_vm6 = vcmp.eq.f32.partialorder %v1017_v32, -inf  ;;  %v1276_v49 = vsel %vm1148_vm4, %v2546_v48, 1073741824  ;;  %v2920_v60 = vcvt.s32.f32 %v1766_v45 }
 0x219   :  { %3487 = vst [vmem:[#allocation20_spill] sm:$0xff] %v2910_v36  ;;  %vm1151_vm7 = vcmp.eq.f32.partialorder %v3488_v53, %v1022_v7  ;;  %vm1152_vm8 = vcmp.eq.f32.partialorder %v3489_v61, %v1022_v7  ;;  %1749 = vmin.xlane.f32.xlu0 %v2910_v36  ;;  %v1277_v10 = vsel %vm1149_vm5, %v2549_v8, 1073741824  ;;  %vm1819_vm9 = vcmp.lt.s32.totalorder %v1275_v14, %v1276_v49 }
 0x21a   :  { %3490 = vst [vmem:[#allocation21_spill] sm:$0xff] %v2920_v60  ;;  %vm1153_vm10 = vcmp.eq.f32.partialorder %v3491_v17, %v1022_v7  ;;  %vm2053_vm11 = vcmp.eq.f32.partialorder %v1022_v7, -inf  ;;  %v1279_v39 = vsel %vm1151_vm7, %v2543_v59, 1073741824  ;;  %v1280_v28 = vsel %vm1152_vm8, %v2546_v48, 1073741824  ;;  %1769 = vmin.xlane.f32.xlu1 %v2920_v60  ;;  %v3493_v60 = vld [vmem:[#allocation43_spill] sm:$0xff] }
 0x21b   :  { %v1281_v57 = vsel %vm1153_vm10, %v2549_v8, 1073741824  ;;  %vm1839_vm12 = vcmp.lt.s32.totalorder %v1279_v39, %v1280_v28  ;;  %vm1783_vm13 = vcmp.lt.s32.totalorder %v1782_v37, %v1270_v43  ;;  %v1802_v45 = vsel %vm1801_vm14, %v1800_v13, %v1273_v22 }
 0x21c   :  { %v2929_v30 = vsel %vm1783_vm13, %v1782_v37, %v1270_v43  ;;  %v1278_v53 = vsel %vm2052_vm6, %v2557_v25, 1073741824  ;;  %v1820_v61 = vsel %vm1819_vm9, %v1275_v14, %v1276_v49  ;;  %vm1803_vm15 = vcmp.lt.s32.totalorder %v1802_v45, %v1274_v6  ;;  %v3496_v49 = vld [vmem:[#allocation45_spill] sm:$0xff] }
 0x21d   :  { %v1786_v17 = vshra.s32 %v2929_v30, 16  ;;  %vm1821_vm0 = vcmp.lt.s32.totalorder %v1820_v61, %v1277_v10  ;;  %v1840_v31 = vsel %vm1839_vm12, %v1279_v39, %v1280_v28  ;;  %v2934_v27 = vsel %vm1803_vm15, %v1802_v45, %v1274_v6  ;;  %v3499_v39 = vld [vmem:[#allocation46_spill] sm:$0xff] }
 0x21e   :  { %v1027_v36 = vpop.xlane.xlu0 %1026  ;;  %3492 = vst [vmem:[#allocation19_spill] sm:$0xff] %v2934_v27  ;;  %v1806_v32 = vshra.s32 %v2934_v27, 16  ;;  %v1282_v14 = vsel %vm2053_vm11, %v2557_v25, 1073741824  ;;  %v1822_v37 = vsel %vm1821_vm0, %v1820_v61, %v1277_v10  ;;  %vm1841_vm12 = vcmp.lt.s32.totalorder %v1840_v31, %v1281_v57  ;;  %v3501_v27 = vld [vmem:[#allocation49_spill] sm:$0xff] }
 0x21f   :  { %vm1155_vm1 = vcmp.eq.f32.partialorder %v3493_v60, %v1027_v36  ;;  %vm1156_vm2 = vcmp.eq.f32.partialorder %v3494_v62, %v1027_v36  ;;  %vm1157_vm3 = vcmp.eq.f32.partialorder %v2507_v19, %v1027_v36  ;;  %v2939_v43 = vcvt.s32.f32 %v1786_v17  ;;  %v3497_v60 = vld [vmem:[#allocation47_spill] sm:$0xff] }
 0x220   :  { %v1283_v22 = vsel %vm1155_vm1, %v2543_v59, 1073741824  ;;  %v1032_v13 = vpop.xlane.xlu1 %1031  ;;  %vm2054_vm4 = vcmp.eq.f32.partialorder %v1027_v36, -inf  ;;  %v1284_v6 = vsel %vm1156_vm2, %v2546_v48, 1073741824  ;;  %v2949_v19 = vcvt.s32.f32 %v1806_v32 }
 0x221   :  { %3495 = vst [vmem:[#allocation22_spill] sm:$0xff] %v2939_v43  ;;  %vm1159_vm5 = vcmp.eq.f32.partialorder %v3496_v49, %v1032_v13  ;;  %vm1160_vm6 = vcmp.eq.f32.partialorder %v3497_v60, %v1032_v13  ;;  %1789 = vmin.xlane.f32.xlu0 %v2939_v43  ;;  %v1285_v62 = vsel %vm1157_vm3, %v2549_v8, 1073741824  ;;  %vm1859_vm7 = vcmp.lt.s32.totalorder %v1283_v22, %v1284_v6 }
 0x222   :  { %3498 = vst [vmem:[#allocation24_spill] sm:$0xff] %v2949_v19  ;;  %vm1161_vm8 = vcmp.eq.f32.partialorder %v3499_v39, %v1032_v13  ;;  %vm2055_vm9 = vcmp.eq.f32.partialorder %v1032_v13, -inf  ;;  %v1287_v7 = vsel %vm1159_vm5, %v2543_v59, 1073741824  ;;  %v1288_v28 = vsel %vm1160_vm6, %v2546_v48, 1073741824  ;;  %1809 = vmin.xlane.f32.xlu1 %v2949_v19  ;;  %v3500_v19 = vld [vmem:[#allocation48_spill] sm:$0xff] }
 0x223   :  { %v1289_v45 = vsel %vm1161_vm8, %v2549_v8, 1073741824  ;;  %vm1879_vm10 = vcmp.lt.s32.totalorder %v1287_v7, %v1288_v28  ;;  %vm1823_vm11 = vcmp.lt.s32.totalorder %v1822_v37, %v1278_v53  ;;  %v1842_v32 = vsel %vm1841_vm12, %v1840_v31, %v1281_v57 }
 0x224   :  { %v2958_v17 = vsel %vm1823_vm11, %v1822_v37, %v1278_v53  ;;  %v1286_v49 = vsel %vm2054_vm4, %v2557_v25, 1073741824  ;;  %v1860_v60 = vsel %vm1859_vm7, %v1283_v22, %v1284_v6  ;;  %vm1843_vm13 = vcmp.lt.s32.totalorder %v1842_v32, %v1282_v14  ;;  %v3502_v6 = vld [vmem:[#allocation51_spill] sm:$0xff] }
 0x225   :  { %v1826_v39 = vshra.s32 %v2958_v17, 16  ;;  %vm1861_vm14 = vcmp.lt.s32.totalorder %v1860_v60, %v1285_v62  ;;  %v1880_v10 = vsel %vm1879_vm10, %v1287_v7, %v1288_v28  ;;  %v2963_v61 = vsel %vm1843_vm13, %v1842_v32, %v1282_v14 }
 0x226   :  { %v1037_v43 = vpop.xlane.xlu0 %1036  ;;  %v1846_v36 = vshra.s32 %v2963_v61, 16  ;;  %v1290_v22 = vsel %vm2055_vm9, %v2557_v25, 1073741824  ;;  %v1862_v28 = vsel %vm1861_vm14, %v1860_v60, %v1285_v62  ;;  %vm1881_vm10 = vcmp.lt.s32.totalorder %v1880_v10, %v1289_v45 }
 0x227   :  { %vm1163_vm15 = vcmp.eq.f32.partialorder %v3500_v19, %v1037_v43  ;;  %vm1164_vm0 = vcmp.eq.f32.partialorder %v3501_v27, %v1037_v43  ;;  %vm1165_vm1 = vcmp.eq.f32.partialorder %v2525_v0, %v1037_v43  ;;  %v2968_v53 = vcvt.s32.f32 %v1826_v39  ;;  %v3503_v19 = vld [vmem:[#allocation50_spill] sm:$0xff] }
 0x228   :  { %v1291_v57 = vsel %vm1163_vm15, %v2543_v59, 1073741824  ;;  %v1042_v31 = vpop.xlane.xlu1 %1041  ;;  %vm2056_vm2 = vcmp.eq.f32.partialorder %v1037_v43, -inf  ;;  %v1292_v14 = vsel %vm1164_vm0, %v2546_v48, 1073741824  ;;  %v2978_v0 = vcvt.s32.f32 %v1846_v36 }
 0x229   :  { %vm1167_vm3 = vcmp.eq.f32.partialorder %v2533_v1, %v1042_v31  ;;  %vm1168_vm4 = vcmp.eq.f32.partialorder %v3502_v6, %v1042_v31  ;;  %1829 = vmin.xlane.f32.xlu0 %v2968_v53  ;;  %v1293_v27 = vsel %vm1165_vm1, %v2549_v8, 1073741824  ;;  %vm1899_vm5 = vcmp.lt.s32.totalorder %v1291_v57, %v1292_v14 }
 0x22a   :  { %vm1169_vm6 = vcmp.eq.f32.partialorder %v3503_v19, %v1042_v31  ;;  %vm2057_vm7 = vcmp.eq.f32.partialorder %v1042_v31, -inf  ;;  %v1295_v13 = vsel %vm1167_vm3, %v2543_v59, 1073741824  ;;  %v1296_v7 = vsel %vm1168_vm4, %v2546_v48, 1073741824  ;;  %1849 = vmin.xlane.f32.xlu1 %v2978_v0 }
 0x22b   :  { %v1297_v1 = vsel %vm1169_vm6, %v2549_v8, 1073741824  ;;  %vm1919_vm8 = vcmp.lt.s32.totalorder %v1295_v13, %v1296_v7  ;;  %vm1863_vm9 = vcmp.lt.s32.totalorder %v1862_v28, %v1286_v49  ;;  %v1882_v32 = vsel %vm1881_vm10, %v1880_v10, %v1289_v45 }
 0x22c   :  { %v2987_v37 = vsel %vm1863_vm9, %v1862_v28, %v1286_v49  ;;  %v1294_v39 = vsel %vm2056_vm2, %v2557_v25, 1073741824  ;;  %v1900_v36 = vsel %vm1899_vm5, %v1291_v57, %v1292_v14  ;;  %vm1883_vm11 = vcmp.lt.s32.totalorder %v1882_v32, %v1290_v22 }
 0x22d   :  { %v1866_v59 = vshra.s32 %v2987_v37, 16  ;;  %vm1901_vm12 = vcmp.lt.s32.totalorder %v1900_v36, %v1293_v27  ;;  %v1920_v48 = vsel %vm1919_vm8, %v1295_v13, %v1296_v7  ;;  %v2992_v62 = vsel %vm1883_vm11, %v1882_v32, %v1290_v22 }
 0x22e   :  { %v1902_v60 = vsel %vm1901_vm12, %v1900_v36, %v1293_v27  ;;  %v1298_v8 = vsel %vm2057_vm7, %v2557_v25, 1073741824  ;;  %vm1921_vm13 = vcmp.lt.s32.totalorder %v1920_v48, %v1297_v1  ;;  %v1886_v45 = vshra.s32 %v2992_v62, 16 }
 0x22f   :  { %v2996_v6 = vcvt.s32.f32 %v1866_v59  ;;  %vm1903_vm14 = vcmp.lt.s32.totalorder %v1902_v60, %v1294_v39  ;;  %v1922_v43 = vsel %vm1921_vm13, %v1920_v48, %v1297_v1  ;;  %v1305_v27 = vand.u32 65535, %v2571_v20 }
 0x230   :  { %v2999_v49 = vsel %vm1903_vm14, %v1902_v60, %v1294_v39  ;;  %vm1923_vm15 = vcmp.lt.s32.totalorder %v1922_v43, %v1298_v8  ;;  %v3002_v10 = vcvt.s32.f32 %v1886_v45  ;;  %v1325_v28 = vand.u32 65535, %v2586_v4  ;;  %v3504_v39 = vld [vmem:[#allocation52_spill] sm:$0xff] }
 0x231   :  { %1869 = vmin.xlane.f32.xlu0 %v2996_v6  ;;  %v1906_v57 = vshra.s32 %v2999_v49, 16  ;;  %v3005_v22 = vsel %vm1923_vm15, %v1922_v43, %v1298_v8  ;;  %v1307_v13 = vcvt.s32.f32 %v1305_v27  ;;  %v1345_v36 = vand.u32 65535, %v2608_v15 }
 0x232   :  { %v1926_v25 = vshra.s32 %v3005_v22, 16  ;;  %1889 = vmin.xlane.f32.xlu1 %v3002_v10  ;;  %v1327_v32 = vcvt.s32.f32 %v1325_v28  ;;  %v1365_v60 = vand.u32 65535, %v2611_v63  ;;  %v1385_v45 = vand.u32 65535, %v2638_v3 }
 0x233   :  { %v3009_v31 = vcvt.s32.f32 %v1906_v57  ;;  %v1347_v48 = vcvt.s32.f32 %v1345_v36  ;;  %v1405_v43 = vand.u32 65535, %v2645_v21  ;;  %v1445_v21 = vand.u32 65535, %v2675_v2 }
 0x234   :  { %v3011_v14 = vcvt.s32.f32 %v1926_v25  ;;  %v1367_v8 = vcvt.s32.f32 %v1365_v60  ;;  %v1387_v63 = vcvt.s32.f32 %v1385_v45  ;;  %v1485_v2 = vand.u32 65535, %v2702_v56 }
 0x235   :  { %1909 = vmin.xlane.f32.xlu0 %v3009_v31  ;;  %v1407_v27 = vcvt.s32.f32 %v1405_v43  ;;  %v1525_v56 = vand.u32 65535, %v2731_v12  ;;  %v1565_v12 = vand.u32 65535, %v2760_v33  ;;  %v1605_v33 = vand.u32 65535, %v2789_v52 }
 0x236   :  { %1929 = vmin.xlane.f32.xlu1 %v3011_v14  ;;  %v1645_v52 = vand.u32 65535, %v2818_v44 }
 0x237   :  { %v1527_v45 = vcvt.s32.f32 %v1525_v56 }
 0x249   :  { %v3016_v19 = vpop.xlane.xlu0 %1309 }
 0x24a   :  { %vm1311_vm0 = vcmp.eq.f32.partialorder %v2582_v50, %v3016_v19 }
 0x24b   :  { %v1312_v7 = vsel %vm1311_vm0, %v1307_v13, inf }
 0x24c   :  { %1313 = vmin.xlane.f32.xlu0 %v1312_v7 }
 0x24e   :  { %v3021_v1 = vpop.xlane.xlu1 %1329 }
 0x24f   :  { %vm1331_vm1 = vcmp.eq.f32.partialorder %v3504_v39, %v3021_v1 }
 0x250   :  { %v1332_v59 = vsel %vm1331_vm1, %v1327_v32, inf  ;;  %v1447_v32 = vcvt.s32.f32 %v1445_v21  ;;  %v1607_v21 = vcvt.s32.f32 %v1605_v33 }
 0x251   :  { %1333 = vmin.xlane.f32.xlu1 %v1332_v59 }
 0x254   :  { %v3026_v20 = vpop.xlane.xlu0 %1349 }
 0x255   :  { %vm1351_vm2 = vcmp.eq.f32.partialorder %v2615_v9, %v3026_v20 }
 0x256   :  { %v1352_v50 = vsel %vm1351_vm2, %v1347_v48, inf  ;;  %v1487_v48 = vcvt.s32.f32 %v1485_v2  ;;  %v3506_v2 = vld [vmem:[#allocation8_spill] sm:$0xff] }
 0x257   :  { %1353 = vmin.xlane.f32.xlu0 %v1352_v50  ;;  %v3031_v4 = vpop.xlane.xlu1 %1369 }
 0x258   :  { %vm1371_vm3 = vcmp.eq.f32.partialorder %v2632_v55, %v3031_v4  ;;  %v1425_v55 = vand.u32 65535, %v2667_v38  ;;  %v1465_v38 = vand.u32 65535, %v2697_v58  ;;  %v1505_v58 = vand.u32 65535, %v2726_v18 }
 0x259   :  { %v1372_v15 = vsel %vm1371_vm3, %v1367_v8, inf  ;;  %v1545_v18 = vand.u32 65535, %v2755_v42  ;;  %v1585_v42 = vand.u32 65535, %v2784_v47  ;;  %v1625_v47 = vand.u32 65535, %v2813_v26 }
 0x25a   :  { %1373 = vmin.xlane.f32.xlu1 %v1372_v15  ;;  %v1427_v7 = vcvt.s32.f32 %v1425_v55  ;;  %v1467_v36 = vcvt.s32.f32 %v1465_v38  ;;  %v1507_v50 = vcvt.s32.f32 %v1505_v58  ;;  %v1647_v38 = vcvt.s32.f32 %v1645_v52  ;;  %v3509_v58 = vld [vmem:[#allocation11_spill] sm:$0xff]  ;;  %v3515_v52 = vld [vmem:[#allocation17_spill] sm:$0xff] }
 0x25b   :  { %v1547_v43 = vcvt.s32.f32 %v1545_v18  ;;  %v1587_v55 = vcvt.s32.f32 %v1585_v42  ;;  %v3511_v18 = vld [vmem:[#allocation15_spill] sm:$0xff]  ;;  %v3513_v42 = vld [vmem:[#allocation16_spill] sm:$0xff] }
 0x25c   :  { %v3037_v57 = vpop.xlane.xlu0 %1389 }
 0x25d   :  { %vm1391_vm4 = vcmp.eq.f32.partialorder %v2643_v16, %v3037_v57 }
 0x25e   :  { %v1392_v9 = vsel %vm1391_vm4, %v1387_v63, inf }
 0x25f   :  { %1393 = vmin.xlane.f32.xlu0 %v1392_v9  ;;  %v1567_v9 = vcvt.s32.f32 %v1565_v12  ;;  %v1705_v12 = vand.u32 65535, %v3511_v18 }
 0x260   :  { %v3041_v25 = vpop.xlane.xlu1 %1409 }
 0x261   :  { %vm1411_vm5 = vcmp.eq.f32.partialorder %v2660_v35, %v3041_v25 }
 0x262   :  { %v1412_v3 = vsel %vm1411_vm5, %v1407_v27, inf }
 0x263   :  { %1413 = vmin.xlane.f32.xlu1 %v1412_v3 }
 0x265   :  { %v3047_v13 = vpop.xlane.xlu0 %1429 }
 0x266   :  { %vm1431_vm6 = vcmp.eq.f32.partialorder %v2673_v23, %v3047_v13 }
 0x267   :  { %v1432_v16 = vsel %vm1431_vm6, %v1427_v7, inf }
 0x268   :  { %v3051_v28 = vpop.xlane.xlu1 %1449  ;;  %1433 = vmin.xlane.f32.xlu0 %v1432_v16  ;;  %v1627_v16 = vcvt.s32.f32 %v1625_v47  ;;  %v1745_v47 = vand.u32 65535, %v2900_v54  ;;  %v1785_v54 = vand.u32 65535, %v2929_v30  ;;  %v1825_v30 = vand.u32 65535, %v2958_v17 }
 0x269   :  { %vm1451_vm7 = vcmp.eq.f32.partialorder %v2688_v46, %v3051_v28  ;;  %v1865_v17 = vand.u32 65535, %v2987_v37 }
 0x26a   :  { %v1452_v35 = vsel %vm1451_vm7, %v1447_v32, inf  ;;  %v3505_v32 = vld [vmem:[#allocation9_spill] sm:$0xff] }
 0x26b   :  { %1453 = vmin.xlane.f32.xlu1 %v1452_v35 }
 0x26e   :  { %v3057_v39 = vpop.xlane.xlu0 %1469 }
 0x26f   :  { %vm1471_vm8 = vcmp.eq.f32.partialorder %v2707_v34, %v3057_v39  ;;  %v3061_v23 = vpop.xlane.xlu1 %1489 }
 0x270   :  { %v1472_v59 = vsel %vm1471_vm8, %v1467_v36, inf  ;;  %vm1491_vm9 = vcmp.eq.f32.partialorder %v2717_v5, %v3061_v23  ;;  %v3507_v36 = vld [vmem:[#allocation10_spill] sm:$0xff] }
 0x271   :  { %1473 = vmin.xlane.f32.xlu0 %v1472_v59  ;;  %v1492_v46 = vsel %vm1491_vm9, %v1487_v48, inf  ;;  %v1665_v26 = vand.u32 65535, %v3507_v36  ;;  %v3508_v59 = vld [vmem:[#allocation12_spill] sm:$0xff] }
 0x272   :  { %1493 = vmin.xlane.f32.xlu1 %v1492_v46  ;;  %v1685_v44 = vand.u32 65535, %v3508_v59 }
 0x273   :  { %v1667_v46 = vcvt.s32.f32 %v1665_v26  ;;  %v3517_v26 = vld [vmem:[#allocation21_spill] sm:$0xff] }
 0x276   :  { %v3067_v60 = vpop.xlane.xlu0 %1509 }
 0x277   :  { %vm1511_vm10 = vcmp.eq.f32.partialorder %v2736_v11, %v3067_v60  ;;  %v3071_v34 = vpop.xlane.xlu1 %1529 }
 0x278   :  { %v1512_v8 = vsel %vm1511_vm10, %v1507_v50, inf  ;;  %vm1531_vm11 = vcmp.eq.f32.partialorder %v2746_v29, %v3071_v34 }
 0x279   :  { %1513 = vmin.xlane.f32.xlu0 %v1512_v8  ;;  %v1532_v5 = vsel %vm1531_vm11, %v1527_v45, inf  ;;  %v1687_v8 = vcvt.s32.f32 %v1685_v44  ;;  %v3510_v45 = vld [vmem:[#allocation14_spill] sm:$0xff]  ;;  %v3518_v44 = vld [vmem:[#allocation19_spill] sm:$0xff] }
 0x27a   :  { %1533 = vmin.xlane.f32.xlu1 %v1532_v5 }
 0x27e   :  { %v3077_v15 = vpop.xlane.xlu0 %1549 }
 0x27f   :  { %vm1551_vm12 = vcmp.eq.f32.partialorder %v2765_v40, %v3077_v15  ;;  %v3081_v11 = vpop.xlane.xlu1 %1569 }
 0x280   :  { %v1552_v63 = vsel %vm1551_vm12, %v1547_v43, inf  ;;  %vm1571_vm13 = vcmp.eq.f32.partialorder %v2775_v24, %v3081_v11  ;;  %v3512_v43 = vld [vmem:[#allocation13_spill] sm:$0xff] }
 0x281   :  { %1553 = vmin.xlane.f32.xlu0 %v1552_v63  ;;  %v1572_v29 = vsel %vm1571_vm13, %v1567_v9, inf  ;;  %v1725_v63 = vand.u32 65535, %v3512_v43 }
 0x282   :  { %1573 = vmin.xlane.f32.xlu1 %v1572_v29  ;;  %v1707_v29 = vcvt.s32.f32 %v1705_v12  ;;  %v3520_v12 = vld [vmem:[#allocation24_spill] sm:$0xff] }
 0x286   :  { %v3087_v27 = vpop.xlane.xlu0 %1589 }
 0x287   :  { %vm1591_vm14 = vcmp.eq.f32.partialorder %v2794_v41, %v3087_v27  ;;  %v3091_v40 = vpop.xlane.xlu1 %1609 }
 0x288   :  { %v1592_v3 = vsel %vm1591_vm14, %v1587_v55, inf  ;;  %vm1611_vm15 = vcmp.eq.f32.partialorder %v2804_v51, %v3091_v40 }
 0x289   :  { %1593 = vmin.xlane.f32.xlu0 %v1592_v3  ;;  %v1612_v24 = vsel %vm1611_vm15, %v1607_v21, inf  ;;  %v1727_v3 = vcvt.s32.f32 %v1725_v63  ;;  %v3514_v21 = vld [vmem:[#allocation18_spill] sm:$0xff]  ;;  %v1845_v63 = vand.u32 65535, %v2963_v61  ;;  %v1885_v61 = vand.u32 65535, %v2992_v62 }
 0x28a   :  { %1613 = vmin.xlane.f32.xlu1 %v1612_v24 }
 0x28e   :  { %v3097_v7 = vpop.xlane.xlu0 %1629 }
 0x28f   :  { %vm1631_vm0 = vcmp.eq.f32.partialorder %v3505_v32, %v3097_v7  ;;  %v3101_v41 = vpop.xlane.xlu1 %1649 }
 0x290   :  { %v1632_v35 = vsel %vm1631_vm0, %v1627_v16, inf  ;;  %vm1651_vm1 = vcmp.eq.f32.partialorder %v3506_v2, %v3101_v41  ;;  %v1765_v16 = vand.u32 65535, %v3515_v52  ;;  %v1867_v52 = vcvt.s32.f32 %v1865_v17 }
 0x291   :  { %1633 = vmin.xlane.f32.xlu0 %v1632_v35  ;;  %v1652_v51 = vsel %vm1651_vm1, %v1647_v38, inf  ;;  %v1747_v35 = vcvt.s32.f32 %v1745_v47  ;;  %v3516_v38 = vld [vmem:[#allocation20_spill] sm:$0xff]  ;;  %vm1939_vm0 = vcmask 7168  }
 0x292   :  { %1653 = vmin.xlane.f32.xlu1 %v1652_v51  ;;  %v1767_v36 = vcvt.s32.f32 %v1765_v16  ;;  %v1905_v16 = vand.u32 65535, %v2999_v49 }
 0x296   :  { %v3107_v48 = vpop.xlane.xlu0 %1669 }
 0x297   :  { %vm1671_vm2 = vcmp.eq.f32.partialorder %v3509_v58, %v3107_v48  ;;  %v3111_v56 = vpop.xlane.xlu1 %1689 }
 0x298   :  { %v1672_v50 = vsel %vm1671_vm2, %v1667_v46, inf  ;;  %vm1691_vm3 = vcmp.eq.f32.partialorder %v3510_v45, %v3111_v56  ;;  %v1805_v46 = vand.u32 65535, %v3518_v44  ;;  %v1336_v44 = vcvt.f32.s32 %v3021_v1 }
 0x299   :  { %1673 = vmin.xlane.f32.xlu0 %v1672_v50  ;;  %v1692_v5 = vsel %vm1691_vm3, %v1687_v8, inf  ;;  %v1787_v50 = vcvt.s32.f32 %v1785_v54  ;;  %v3519_v8 = vld [vmem:[#allocation22_spill] sm:$0xff]  ;;  %v1376_v1 = vcvt.f32.s32 %v3031_v4 }
 0x29a   :  { %1693 = vmin.xlane.f32.xlu1 %v1692_v5  ;;  %v1807_v18 = vcvt.s32.f32 %v1805_v46 }
 0x29e   :  { %v3117_v9 = vpop.xlane.xlu0 %1709 }
 0x29f   :  { %vm1711_vm4 = vcmp.eq.f32.partialorder %v3513_v42, %v3117_v9  ;;  %v3121_v33 = vpop.xlane.xlu1 %1729  ;;  %v1827_v42 = vcvt.s32.f32 %v1825_v30 }
 0x2a0   :  { %v1712_v55 = vsel %vm1711_vm4, %v1707_v29, inf  ;;  %vm1731_vm5 = vcmp.eq.f32.partialorder %v3514_v21, %v3121_v33  ;;  %v1847_v21 = vcvt.s32.f32 %v1845_v63  ;;  %v1377_v63 = vshll.u32 %v1376_v1, 16 }
 0x2a1   :  { %1713 = vmin.xlane.f32.xlu0 %v1712_v55  ;;  %v1732_v24 = vsel %vm1731_vm5, %v1727_v3, inf }
 0x2a2   :  { %1733 = vmin.xlane.f32.xlu1 %v1732_v24 }
 0x2a6   :  { %v3127_v32 = vpop.xlane.xlu0 %1749 }
 0x2a7   :  { %vm1751_vm6 = vcmp.eq.f32.partialorder %v3516_v38, %v3127_v32  ;;  %v3131_v2 = vpop.xlane.xlu1 %1769  ;;  %v1887_v38 = vcvt.s32.f32 %v1885_v61 }
 0x2a8   :  { %v1752_v51 = vsel %vm1751_vm6, %v1747_v35, inf  ;;  %vm1771_vm7 = vcmp.eq.f32.partialorder %v3517_v26, %v3131_v2 }
 0x2a9   :  { %1753 = vmin.xlane.f32.xlu0 %v1752_v51  ;;  %v1772_v59 = vsel %vm1771_vm7, %v1767_v36, inf  ;;  %v1907_v51 = vcvt.s32.f32 %v1905_v16 }
 0x2aa   :  { %1773 = vmin.xlane.f32.xlu1 %v1772_v59 }
 0x2ae   :  { %v3137_v58 = vpop.xlane.xlu0 %1789 }
 0x2af   :  { %vm1791_vm8 = vcmp.eq.f32.partialorder %v3519_v8, %v3137_v58  ;;  %v3141_v45 = vpop.xlane.xlu1 %1809 }
 0x2b0   :  { %v1792_v5 = vsel %vm1791_vm8, %v1787_v50, inf  ;;  %vm1811_vm9 = vcmp.eq.f32.partialorder %v3520_v12, %v3141_v45  ;;  %v1337_v50 = vshll.u32 %v1336_v44, 16 }
 0x2b1   :  { %1793 = vmin.xlane.f32.xlu0 %v1792_v5  ;;  %v1812_v43 = vsel %vm1811_vm9, %v1807_v18, inf }
 0x2b2   :  { %1813 = vmin.xlane.f32.xlu1 %v1812_v43 }
 0x2b6   :  { %v3147_v29 = vpop.xlane.xlu0 %1829 }
 0x2b7   :  { %vm1831_vm10 = vcmp.eq.f32.partialorder %v2968_v53, %v3147_v29  ;;  %v3151_v55 = vpop.xlane.xlu1 %1849 }
 0x2b8   :  { %v1832_v3 = vsel %vm1831_vm10, %v1827_v42, inf  ;;  %vm1851_vm11 = vcmp.eq.f32.partialorder %v2978_v0, %v3151_v55  ;;  %v1925_v0 = vand.u32 65535, %v3005_v22  ;;  %v1396_v42 = vcvt.f32.s32 %v3037_v57 }
 0x2b9   :  { %1833 = vmin.xlane.f32.xlu0 %v1832_v3  ;;  %v1852_v24 = vsel %vm1851_vm11, %v1847_v21, inf  ;;  %v1416_v21 = vcvt.f32.s32 %v3041_v25 }
 0x2ba   :  { %1853 = vmin.xlane.f32.xlu1 %v1852_v24  ;;  %v1927_v36 = vcvt.s32.f32 %v1925_v0  ;;  %v1397_v17 = vshll.u32 %v1396_v42, 16 }
 0x2bb   :  { %v1417_v57 = vshll.u32 %v1416_v21, 16 }
 0x2be   :  { %v3157_v47 = vpop.xlane.xlu0 %1869 }
 0x2bf   :  { %vm1871_vm12 = vcmp.eq.f32.partialorder %v2996_v6, %v3157_v47  ;;  %v3162_v53 = vpop.xlane.xlu1 %1889 }
 0x2c0   :  { %v1872_v35 = vsel %vm1871_vm12, %v1867_v52, inf  ;;  %vm1891_vm13 = vcmp.eq.f32.partialorder %v3002_v10, %v3162_v53  ;;  %v1316_v10 = vcvt.f32.s32 %v3016_v19 }
 0x2c1   :  { %1873 = vmin.xlane.f32.xlu0 %v1872_v35  ;;  %v1892_v37 = vsel %vm1891_vm13, %v1887_v38, inf  ;;  %v1436_v35 = vcvt.f32.s32 %v3047_v13  ;;  %v1456_v38 = vcvt.f32.s32 %v3051_v28 }
 0x2c2   :  { %v3167_v62 = vpop.xlane.xlu0 %1909  ;;  %1893 = vmin.xlane.f32.xlu1 %v1892_v37  ;;  %v1317_v59 = vshll.u32 %v1316_v10, 16  ;;  %v1476_v10 = vcvt.f32.s32 %v3057_v39 }
 0x2c3   :  { %vm1911_vm14 = vcmp.eq.f32.partialorder %v3009_v31, %v3167_v62  ;;  %v3171_v49 = vpop.xlane.xlu1 %1929  ;;  %v1437_v37 = vshll.u32 %v1436_v35, 16 }
 0x2c4   :  { %v1912_v6 = vsel %vm1911_vm14, %v1907_v51, inf  ;;  %vm1931_vm15 = vcmp.eq.f32.partialorder %v3011_v14, %v3171_v49  ;;  %v1356_v14 = vcvt.f32.s32 %v3026_v20 }
 0x2c5   :  { %1913 = vmin.xlane.f32.xlu0 %v1912_v6  ;;  %v1932_v22 = vsel %vm1931_vm15, %v1927_v36, inf }
 0x2c6   :  { %1933 = vmin.xlane.f32.xlu1 %v1932_v22  ;;  %v1357_v18 = vshll.u32 %v1356_v14, 16  ;;  %v1457_v22 = vshll.u32 %v1456_v38, 16  ;;  %v1516_v14 = vcvt.f32.s32 %v3067_v60 }
 0x2d9   :  { %v1314_v26 = vpop.xlane.xlu0 %1313 }
 0x2da   :  { %v1315_v54 = vcvt.f32.s32 %v1314_v26  ;;  %v1496_v26 = vcvt.f32.s32 %v3061_v23  ;;  %v1536_v23 = vcvt.f32.s32 %v3071_v34 }
 0x2dc   :  { %v1318_v46 = vadd.s32 %v1317_v59, %v1315_v54  ;;  %v1477_v54 = vshll.u32 %v1476_v10, 16 }
 0x2de   :  { %1940 = vst.msk [vmem:[%s3337_s2] sm:$0xff] %vm1939_vm0, %v1318_v46  ;;  %v1334_v31 = vpop.xlane.xlu1 %1333 }
 0x2df   :  { %v1335_v8 = vcvt.f32.s32 %v1334_v31  ;;  %v1497_v31 = vshll.u32 %v1496_v26, 16  ;;  %v1696_v26 = vcvt.f32.s32 %v3111_v56 }
 0x2e1   :  { %v1338_v5 = vadd.s32 %v1337_v50, %v1335_v8 }
 0x2e3   :  { %1941 = vst.msk [vmem:[%s3337_s2 + $0x8] sm:$0xff] %vm1939_vm0, %v1338_v5 }
 0x2e4   :  { %v1354_v19 = vpop.xlane.xlu0 %1353 }
 0x2e5   :  { %v1355_v12 = vcvt.f32.s32 %v1354_v19  ;;  %v1517_v19 = vshll.u32 %v1516_v14, 16  ;;  %v1736_v14 = vcvt.f32.s32 %v3121_v33 }
 0x2e7   :  { %v1358_v43 = vadd.s32 %v1357_v18, %v1355_v12  ;;  %v1374_v30 = vpop.xlane.xlu1 %1373  ;;  %v1537_v12 = vshll.u32 %v1536_v23, 16 }
 0x2e8   :  { %v1375_v20 = vcvt.f32.s32 %v1374_v30  ;;  %v1556_v30 = vcvt.f32.s32 %v3077_v15 }
 0x2e9   :  { %1942 = vst.msk [vmem:[%s3337_s2 + $0x10] sm:$0xff] %vm1939_vm0, %v1358_v43 }
 0x2ea   :  { %v1378_v3 = vadd.s32 %v1377_v63, %v1375_v20  ;;  %v1576_v63 = vcvt.f32.s32 %v3081_v11  ;;  %v1557_v20 = vshll.u32 %v1556_v30, 16 }
 0x2ec   :  { %v1394_v24 = vpop.xlane.xlu0 %1393  ;;  %1943 = vst.msk [vmem:[%s3337_s2 + $0x18] sm:$0xff] %vm1939_vm0, %v1378_v3 }
 0x2ed   :  { %v1395_v4 = vcvt.f32.s32 %v1394_v24  ;;  %v1577_v24 = vshll.u32 %v1576_v63, 16 }
 0x2ef   :  { %v1398_v61 = vadd.s32 %v1397_v17, %v1395_v4  ;;  %v1596_v4 = vcvt.f32.s32 %v3087_v27 }
 0x2f0   :  { %v1414_v52 = vpop.xlane.xlu1 %1413 }
 0x2f1   :  { %v1415_v16 = vcvt.f32.s32 %v1414_v52  ;;  %1944 = vst.msk [vmem:[%s3337_s2 + $0x20] sm:$0xff] %vm1939_vm0, %v1398_v61  ;;  %v1616_v61 = vcvt.f32.s32 %v3091_v40 }
 0x2f3   :  { %v1418_v25 = vadd.s32 %v1417_v57, %v1415_v16  ;;  %v1597_v57 = vshll.u32 %v1596_v4, 16 }
 0x2f5   :  { %1945 = vst.msk [vmem:[%s3337_s2 + $0x28] sm:$0xff] %vm1939_vm0, %v1418_v25  ;;  %v1434_v0 = vpop.xlane.xlu0 %1433  ;;  %v1617_v25 = vshll.u32 %v1616_v61, 16 }
 0x2f6   :  { %v1435_v51 = vcvt.f32.s32 %v1434_v0  ;;  %v1636_v0 = vcvt.f32.s32 %v3097_v7 }
 0x2f8   :  { %v1438_v6 = vadd.s32 %v1437_v37, %v1435_v51  ;;  %v1454_v36 = vpop.xlane.xlu1 %1453  ;;  %v1656_v37 = vcvt.f32.s32 %v3101_v41 }
 0x2f9   :  { %v1455_v13 = vcvt.f32.s32 %v1454_v36 }
 0x2fa   :  { %1946 = vst.msk [vmem:[%s3337_s2 + $0x30] sm:$0xff] %vm1939_vm0, %v1438_v6  ;;  %v1637_v6 = vshll.u32 %v1636_v0, 16 }
 0x2fb   :  { %v1458_v28 = vadd.s32 %v1457_v22, %v1455_v13  ;;  %v1657_v13 = vshll.u32 %v1656_v37, 16  ;;  %v1896_v37 = vcvt.f32.s32 %v3162_v53 }
 0x2fd   :  { %1947 = vst.msk [vmem:[%s3337_s2 + $0x38] sm:$0xff] %vm1939_vm0, %v1458_v28  ;;  %v1676_v28 = vcvt.f32.s32 %v3107_v48 }
 0x2fe   :  { %v1474_v59 = vpop.xlane.xlu0 %1473 }
 0x2ff   :  { %v1475_v44 = vcvt.f32.s32 %v1474_v59  ;;  %v1494_v46 = vpop.xlane.xlu1 %1493 }
 0x300   :  { %v1495_v8 = vcvt.f32.s32 %v1494_v46 }
 0x301   :  { %v1478_v50 = vadd.s32 %v1477_v54, %v1475_v44  ;;  %v1677_v54 = vshll.u32 %v1676_v28, 16 }
 0x302   :  { %v1498_v39 = vadd.s32 %v1497_v31, %v1495_v8  ;;  %v1697_v31 = vshll.u32 %v1696_v26, 16  ;;  %v1716_v8 = vcvt.f32.s32 %v3117_v9 }
 0x303   :  { %1948 = vst.msk [vmem:[%s3337_s2 + $0x40] sm:$0xff] %vm1939_vm0, %v1478_v50 }
 0x304   :  { %1949 = vst.msk [vmem:[%s3337_s2 + $0x48] sm:$0xff] %vm1939_vm0, %v1498_v39  ;;  %v1717_v23 = vshll.u32 %v1716_v8, 16 }
 0x306   :  { %v1514_v5 = vpop.xlane.xlu0 %1513 }
 0x307   :  { %v1515_v18 = vcvt.f32.s32 %v1514_v5  ;;  %v1534_v1 = vpop.xlane.xlu1 %1533 }
 0x308   :  { %v1535_v60 = vcvt.f32.s32 %v1534_v1 }
 0x309   :  { %v1518_v43 = vadd.s32 %v1517_v19, %v1515_v18  ;;  %v1737_v18 = vshll.u32 %v1736_v14, 16 }
 0x30a   :  { %v1538_v34 = vadd.s32 %v1537_v12, %v1535_v60  ;;  %v1756_v12 = vcvt.f32.s32 %v3127_v32 }
 0x30b   :  { %1950 = vst.msk [vmem:[%s3337_s2 + $0x50] sm:$0xff] %vm1939_vm0, %v1518_v43  ;;  %v1776_v43 = vcvt.f32.s32 %v3131_v2 }
 0x30c   :  { %1951 = vst.msk [vmem:[%s3337_s2 + $0x58] sm:$0xff] %vm1939_vm0, %v1538_v34  ;;  %v1757_v30 = vshll.u32 %v1756_v12, 16 }
 0x30e   :  { %v1554_v42 = vpop.xlane.xlu0 %1553 }
 0x30f   :  { %v1555_v3 = vcvt.f32.s32 %v1554_v42  ;;  %v1574_v21 = vpop.xlane.xlu1 %1573  ;;  %v1777_v42 = vshll.u32 %v1776_v43, 16 }
 0x310   :  { %v1575_v15 = vcvt.f32.s32 %v1574_v21  ;;  %v1816_v21 = vcvt.f32.s32 %v3141_v45 }
 0x311   :  { %v1558_v17 = vadd.s32 %v1557_v20, %v1555_v3  ;;  %v1796_v3 = vcvt.f32.s32 %v3137_v58 }
 0x312   :  { %v1578_v11 = vadd.s32 %v1577_v24, %v1575_v15 }
 0x313   :  { %1952 = vst.msk [vmem:[%s3337_s2 + $0x60] sm:$0xff] %vm1939_vm0, %v1558_v17  ;;  %v1797_v17 = vshll.u32 %v1796_v3, 16 }
 0x314   :  { %1953 = vst.msk [vmem:[%s3337_s2 + $0x68] sm:$0xff] %vm1939_vm0, %v1578_v11  ;;  %v1817_v11 = vshll.u32 %v1816_v21, 16 }
 0x316   :  { %v1594_v52 = vpop.xlane.xlu0 %1593 }
 0x317   :  { %v1595_v16 = vcvt.f32.s32 %v1594_v52  ;;  %v1614_v35 = vpop.xlane.xlu1 %1613  ;;  %v1836_v52 = vcvt.f32.s32 %v3147_v29 }
 0x318   :  { %v1615_v27 = vcvt.f32.s32 %v1614_v35 }
 0x319   :  { %v1598_v38 = vadd.s32 %v1597_v57, %v1595_v16  ;;  %v1856_v57 = vcvt.f32.s32 %v3151_v55  ;;  %v1837_v35 = vshll.u32 %v1836_v52, 16 }
 0x31a   :  { %v1618_v40 = vadd.s32 %v1617_v25, %v1615_v27 }
 0x31b   :  { %1954 = vst.msk [vmem:[%s3337_s2 + $0x70] sm:$0xff] %vm1939_vm0, %v1598_v38  ;;  %v1857_v27 = vshll.u32 %v1856_v57, 16 }
 0x31c   :  { %1955 = vst.msk [vmem:[%s3337_s2 + $0x78] sm:$0xff] %vm1939_vm0, %v1618_v40  ;;  %v1876_v40 = vcvt.f32.s32 %v3157_v47  ;;  %v1897_v47 = vshll.u32 %v1896_v37, 16 }
 0x31e   :  { %v1634_v51 = vpop.xlane.xlu0 %1633 }
 0x31f   :  { %v1635_v36 = vcvt.f32.s32 %v1634_v51  ;;  %v1654_v22 = vpop.xlane.xlu1 %1653 }
 0x320   :  { %v1655_v7 = vcvt.f32.s32 %v1654_v22 }
 0x321   :  { %v1638_v10 = vadd.s32 %v1637_v6, %v1635_v36  ;;  %v1877_v6 = vshll.u32 %v1876_v40, 16  ;;  %v1916_v36 = vcvt.f32.s32 %v3167_v62 }
 0x322   :  { %v1658_v41 = vadd.s32 %v1657_v13, %v1655_v7 }
 0x323   :  { %1956 = vst.msk [vmem:[%s3337_s2 + $0x80] sm:$0xff] %vm1939_vm0, %v1638_v10  ;;  %v1936_v10 = vcvt.f32.s32 %v3171_v49  ;;  %v1917_v26 = vshll.u32 %v1916_v36, 16 }
 0x324   :  { %1957 = vst.msk [vmem:[%s3337_s2 + $0x88] sm:$0xff] %vm1939_vm0, %v1658_v41 }
 0x326   :  { %v1674_v59 = vpop.xlane.xlu0 %1673 }
 0x327   :  { %v1675_v44 = vcvt.f32.s32 %v1674_v59  ;;  %v1694_v46 = vpop.xlane.xlu1 %1693 }
 0x328   :  { %v1695_v48 = vcvt.f32.s32 %v1694_v46 }
 0x329   :  { %v1678_v50 = vadd.s32 %v1677_v54, %v1675_v44  ;;  %v1937_v44 = vshll.u32 %v1936_v10, 16 }
 0x32a   :  { %v1698_v56 = vadd.s32 %v1697_v31, %v1695_v48 }
 0x32b   :  { %1958 = vst.msk [vmem:[%s3337_s2 + $0x90] sm:$0xff] %vm1939_vm0, %v1678_v50 }
 0x32c   :  { %1959 = vst.msk [vmem:[%s3337_s2 + $0x98] sm:$0xff] %vm1939_vm0, %v1698_v56 }
 0x32e   :  { %v1714_v39 = vpop.xlane.xlu0 %1713 }
 0x32f   :  { %v1715_v5 = vcvt.f32.s32 %v1714_v39  ;;  %v1734_v19 = vpop.xlane.xlu1 %1733 }
 0x330   :  { %v1735_v9 = vcvt.f32.s32 %v1734_v19 }
 0x331   :  { %v1718_v1 = vadd.s32 %v1717_v23, %v1715_v5 }
 0x332   :  { %v1738_v33 = vadd.s32 %v1737_v18, %v1735_v9 }
 0x333   :  { %1960 = vst.msk [vmem:[%s3337_s2 + $0xa0] sm:$0xff] %vm1939_vm0, %v1718_v1 }
 0x334   :  { %1961 = vst.msk [vmem:[%s3337_s2 + $0xa8] sm:$0xff] %vm1939_vm0, %v1738_v33 }
 0x336   :  { %v1754_v60 = vpop.xlane.xlu0 %1753 }
 0x337   :  { %v1755_v34 = vcvt.f32.s32 %v1754_v60  ;;  %v1774_v63 = vpop.xlane.xlu1 %1773 }
 0x338   :  { %v1775_v32 = vcvt.f32.s32 %v1774_v63 }
 0x339   :  { %v1758_v20 = vadd.s32 %v1757_v30, %v1755_v34 }
 0x33a   :  { %v1778_v2 = vadd.s32 %v1777_v42, %v1775_v32 }
 0x33b   :  { %1962 = vst.msk [vmem:[%s3337_s2 + $0xb0] sm:$0xff] %vm1939_vm0, %v1758_v20 }
 0x33c   :  { %1963 = vst.msk [vmem:[%s3337_s2 + $0xb8] sm:$0xff] %vm1939_vm0, %v1778_v2 }
 0x33e   :  { %v1794_v24 = vpop.xlane.xlu0 %1793 }
 0x33f   :  { %v1795_v15 = vcvt.f32.s32 %v1794_v24  ;;  %v1814_v4 = vpop.xlane.xlu1 %1813 }
 0x340   :  { %v1815_v58 = vcvt.f32.s32 %v1814_v4 }
 0x341   :  { %v1798_v61 = vadd.s32 %v1797_v17, %v1795_v15 }
 0x342   :  { %v1818_v45 = vadd.s32 %v1817_v11, %v1815_v58 }
 0x343   :  { %1964 = vst.msk [vmem:[%s3337_s2 + $0xc0] sm:$0xff] %vm1939_vm0, %v1798_v61 }
 0x344   :  { %1965 = vst.msk [vmem:[%s3337_s2 + $0xc8] sm:$0xff] %vm1939_vm0, %v1818_v45 }
 0x346   :  { %v1834_v16 = vpop.xlane.xlu0 %1833 }
 0x347   :  { %v1835_v25 = vcvt.f32.s32 %v1834_v16  ;;  %v1854_v38 = vpop.xlane.xlu1 %1853 }
 0x348   :  { %v1855_v29 = vcvt.f32.s32 %v1854_v38 }
 0x349   :  { %v1838_v0 = vadd.s32 %v1837_v35, %v1835_v25 }
 0x34a   :  { %v1858_v55 = vadd.s32 %v1857_v27, %v1855_v29 }
 0x34b   :  { %1966 = vst.msk [vmem:[%s3337_s2 + $0xd0] sm:$0xff] %vm1939_vm0, %v1838_v0 }
 0x34c   :  { %1967 = vst.msk [vmem:[%s3337_s2 + $0xd8] sm:$0xff] %vm1939_vm0, %v1858_v55 }
 0x34e   :  { %v1874_v51 = vpop.xlane.xlu0 %1873 }
 0x34f   :  { %v1875_v22 = vcvt.f32.s32 %v1874_v51  ;;  %v1894_v13 = vpop.xlane.xlu1 %1893 }
 0x350   :  { %v1895_v28 = vcvt.f32.s32 %v1894_v13 }
 0x351   :  { %v1878_v7 = vadd.s32 %v1877_v6, %v1875_v22 }
 0x352   :  { %v1914_v41 = vpop.xlane.xlu0 %1913  ;;  %v1898_v53 = vadd.s32 %v1897_v47, %v1895_v28 }
 0x353   :  { %1968 = vst.msk [vmem:[%s3337_s2 + $0xe0] sm:$0xff] %vm1939_vm0, %v1878_v7  ;;  %v1915_v59 = vcvt.f32.s32 %v1914_v41  ;;  %v1934_v54 = vpop.xlane.xlu1 %1933 }
 0x354   :  { %1969 = vst.msk [vmem:[%s3337_s2 + $0xe8] sm:$0xff] %vm1939_vm0, %v1898_v53  ;;  %v1935_v49 = vcvt.f32.s32 %v1934_v54 }
 0x355   :  { %v1918_v62 = vadd.s32 %v1917_v26, %v1915_v59 }
 0x356   :  { %v1938_v46 = vadd.s32 %v1937_v44, %v1935_v49 }
 0x357   :  { %1970 = vst.msk [vmem:[%s3337_s2 + $0xf0] sm:$0xff] %vm1939_vm0, %v1918_v62 }
 0x358   :  { %1971 = vst.msk [vmem:[%s3337_s2 + $0xf8] sm:$0xff] %vm1939_vm0, %v1938_v46 }
 0x359   :  { %1976 = vsyncpa [#allocation3], 1 }
 0x35a   :  { %1977 = vsyncpa [#allocation5], 1 }

</bundles_post_ra>
